<compile_context>
chip_gen: v7x
topology: tpu7x:2x2x1
jax: 0.10.0
libtpu: 0.0.40
codegen_flags: <defaults>
</compile_context>

<pallas_src>
import numpy as np
import jax
import jax.numpy as jnp
from jax.experimental import pallas as pl
from jax.experimental.pallas import tpu as pltpu

BN_EPS = 1e-5
CP = 128  # lane-padded channel width for weights/activations (all real widths <= 100)

# MXU input dtype for the block-2..4 matmuls. Set to jnp.bfloat16 on v6e/v7x for the
# native MXU path (~2-3x matmul at realistic M, half the VMEM for x/w); kept at f32
# here so the toy-shape self-check stays at tight parity with the f32 reference.
MXU_DTYPE = jnp.float32


def _pool4(yf):
    """MaxPool2d(2,2) on phase-major rows: max over the 4 contiguous row chunks."""
    rows = yf.shape[0]
    assert rows % 4 == 0, rows
    q = rows // 4
    if q % 8 == 0:
        # Sublane-aligned slices -> 3 VPU maxes on the single-dot result.
        return jnp.maximum(jnp.maximum(yf[0:q], yf[q:2 * q]),
                           jnp.maximum(yf[2 * q:3 * q], yf[3 * q:4 * q]))
    # q not sublane-aligned (tiny last block): XLU rotations instead of non-8-aligned
    # sublane slices. Correct for any q given rows == 4*q (asserted above).
    m = jnp.maximum(yf, pltpu.roll(yf, shift=2 * q, axis=0))
    m = jnp.maximum(m, pltpu.roll(m, shift=3 * q, axis=0))
    return m[0:q, :]


def _bn_scale(y, g):
    """Training-mode BatchNorm scale gamma*rsqrt(var+eps) from one traversal of y
    (sum + sum-of-squares). The shift is never needed when the BN is folded into the
    next block's weights (it cancels in that block's mean subtraction)."""
    q = y.shape[0]
    s1 = jnp.sum(y, axis=0, keepdims=True)
    s2 = jnp.sum(y * y, axis=0, keepdims=True)
    mean = s1 * (1.0 / q)
    var = jnp.maximum(s2 * (1.0 / q) - mean * mean, 0.0)
    return g * jax.lax.rsqrt(var + BN_EPS)


def _encoder_kernel(x_ref, w1_ref, w_ref, g_ref, beta4_ref, o_ref):
    # x_ref     : (M0, Cin)    phase-major pixel rows, channels UNPADDED (Cin=3)
    # w1_ref    : (8, CP)      block-1 weight rows (rows 0..Cin-1 real, rest zero)
    # w_ref     : (3, CP, CP)  block-2..4 weights (Cin x Cout, zero-padded)
    # g_ref     : (4, 1, CP)   BN gamma per block (zero-padded)
    # beta4_ref : (1, CP)      BN beta of block 4 (betas 1..3 cancel -> not passed)
    # o_ref     : (M_out, CP)
    x = x_ref[...]
    cin = x.shape[1]
    w1 = w1_ref[...]

    # ---- Block 1: 1x1 conv with tiny Cin as rank-1 VPU updates, fused with the
    # 2x2 max-pool. Conv bias dropped: a per-channel constant commutes with the max
    # and cancels exactly in the following training-mode BatchNorm.
    y = x[:, 0:1] * w1[0:1, :]
    for c in range(1, cin):
        y = y + x[:, c:c + 1] * w1[c:c + 1, :]
    y = _pool4(y)
    scale = _bn_scale(y, g_ref[0])  # folded into block 2's weights below

    # ---- Blocks 2..4: fold the previous block's BN scale into this block's weight
    # rows (w' = scale.T * w); BN shift / beta / conv bias are per-output-channel
    # constants that commute with the pool max and cancel in the next training-mode
    # BN, so they are dropped (exact). One dot over the full phase-major chunk, then
    # a tree max over the 4 contiguous sub-chunks.
    n_mm = w_ref.shape[0]
    for i in range(n_mm):
        w_eff = (w_ref[i] * jnp.transpose(scale)).astype(MXU_DTYPE)
        yf = jnp.dot(y.astype(MXU_DTYPE), w_eff,
                     preferred_element_type=jnp.float32)
        y = _pool4(yf)
        if i + 1 < n_mm:
            scale = _bn_scale(y, g_ref[i + 1])

    # ---- Block 4 BatchNorm applied explicitly (nothing to fold it into).
    # Centered (two-pass) variance: only a couple of rows here, and the folded-
    # forward activations are not mean-centered, so this avoids cancellation.
    mean = jnp.mean(y, axis=0, keepdims=True)
    d = y - mean
    var = jnp.mean(d * d, axis=0, keepdims=True)
    s4 = g_ref[n_mm] * jax.lax.rsqrt(var + BN_EPS)
    o_ref[...] = y * s4 + (beta4_ref[...] - mean * s4)


def _phase_perm(H, W):
    """Source-pixel index for each phase-major row position. Key bits are
    (h0,w0,h1,w1,h2,w2,h3,w3) most-significant-first, then the 16x16 macro-block
    index, so every 2x2 pool level is a max over 4 contiguous row chunks and the
    property recurses across all four blocks."""
    assert H % 16 == 0 and W % 16 == 0
    h = np.arange(H)[:, None]
    w = np.arange(W)[None, :]
    key = np.zeros((H, W), dtype=np.int64)
    for l in range(4):
        key = key * 4 + (((h >> l) & 1) * 2 + ((w >> l) & 1))
    key = key * ((H // 16) * (W // 16)) + (h // 16) * (W // 16) + (w // 16)
    return np.argsort(key.reshape(-1))


def _pack_params(params):
    """Pack conv/BN parameters for the kernel:
      - block-1 weight as (8, CP) rows (rank-1 VPU conv path),
      - block-2..4 weights as a lane-padded (3, CP, CP) stack (output stays
        lane-dense for unmasked stores),
      - gammas for all 4 BNs, beta only for BN4 (betas and conv biases of blocks
        1..3 are per-channel constants that cancel under the following
        training-mode BN, so they are not shipped to the kernel)."""
    w1, _, g1, _ = params[0]
    cin, c1 = w1.shape
    w1p = jnp.zeros((8, CP), jnp.float32).at[:cin, :c1].set(w1)
    ws = []
    gs = [jnp.zeros((1, CP), jnp.float32).at[:, :c1].set(g1)]
    for (w, _, g, _) in params[1:4]:
        ci, co = w.shape
        ws.append(jnp.zeros((CP, CP), jnp.float32).at[:ci, :co].set(w))
        gs.append(jnp.zeros((1, CP), jnp.float32).at[:, :co].set(g))
    co4 = params[3][0].shape[1]
    beta4 = jnp.zeros((1, CP), jnp.float32).at[:, :co4].set(params[3][3])
    return w1p, jnp.stack(ws), jnp.stack(gs), beta4


def based_encoder_forward(x_nchw, params):
    N, Cin, H, W = x_nchw.shape
    Cout = params[3][0].shape[1]  # 30
    Ho, Wo = H // 16, W // 16

    # NCHW -> channels-last pixel rows in phase-major order, on the UNPADDED
    # (Cin=3) data: ~1/42 the HBM bytes of the previous 128-lane-padded input.
    # (See module-level TODO for folding this into per-macro-block kernel DMA at
    # realistic image sizes.)
    x = jnp.transpose(x_nchw, (0, 2, 3, 1)).astype(jnp.float32).reshape(N, H * W, Cin)
    idx = _phase_perm(H, W)
    xr = jnp.transpose(x[:, idx, :], (1, 0, 2)).reshape(H * W * N, Cin)

    w1p, w_stack, g_stack, beta4 = _pack_params(params)

    m0 = H * W * N
    m_out = Ho * Wo * N
    flops = 2 * m0 * Cin * CP + 2 * CP * CP * (m0 // 4 + m0 // 16 + m0 // 64)
    bytes_accessed = 4 * (m0 * Cin + 8 * CP + 3 * CP * CP + 4 * CP + CP + m_out * CP)

    out = pl.pallas_call(
        _encoder_kernel,
        out_shape=jax.ShapeDtypeStruct((m_out, CP), jnp.float32),
        in_specs=[pl.BlockSpec(memory_space=pltpu.MemorySpace.VMEM)] * 5,
        out_specs=pl.BlockSpec(memory_space=pltpu.MemorySpace.VMEM),
        cost_estimate=pl.CostEstimate(flops=flops, transcendentals=4 * CP,
                                      bytes_accessed=bytes_accessed),
    )(xr, w1p, w_stack, g_stack, beta4)

    # Rows come out keyed (h_out*Wo + w_out, n): back to NCHW, drop channel padding.
    out = jnp.transpose(out.reshape(Ho * Wo, N, CP), (1, 0, 2))
    out = out.reshape(N, Ho, Wo, CP)[..., :Cout]
    return jnp.transpose(out, (0, 3, 1, 2))


def init_params(key):
    """Deterministic parameters. Conv weights stored as (Cin, Cout) (== squeezed
    PyTorch (Cout, Cin, 1, 1) transposed); BN gamma=1, beta=0 (PyTorch defaults)."""
    dims = [(3, 100), (100, 100), (100, 50), (50, 30), (30, 30)]  # conv1..conv5
    params = []
    for cin, cout in dims:
        key, k1, k2 = jax.random.split(key, 3)
        bound = 1.0 / np.sqrt(cin)  # PyTorch Conv2d default init range
        w = jax.random.uniform(k1, (cin, cout), jnp.float32, -bound, bound)
        b = jax.random.uniform(k2, (cout,), jnp.float32, -bound, bound)
        gamma = jnp.ones((cout,), jnp.float32)
        beta = jnp.zeros((cout,), jnp.float32)
        params.append((w, b, gamma, beta))
    return params


def reference_forward(x_nchw, params):
    """Pure-JAX reference replicating the PyTorch semantics (bias included)."""
    x = jnp.transpose(x_nchw, (0, 2, 3, 1)).astype(jnp.float32)
    for (w, b, g, be) in params[:4]:
        N, H, W, _ = x.shape
        y = jnp.einsum("nhwc,cd->nhwd", x, w) + b                     # 1x1 conv
        y = y.reshape(N, H // 2, 2, W // 2, 2, -1).max(axis=(2, 4))   # MaxPool2d(2,2)
        mean = y.mean(axis=(0, 1, 2), keepdims=True)
        var = ((y - mean) ** 2).mean(axis=(0, 1, 2), keepdims=True)   # biased var
        x = (y - mean) / jnp.sqrt(var + BN_EPS) * g + be              # BN (training)
    return jnp.transpose(x, (0, 3, 1, 2))


if __name__ == "__main__":
    key = jax.random.PRNGKey(0)
    kx, kp = jax.random.split(key)
    # N=2, C_in=3, H=W=16 (16 -> 8 -> 4 -> 2 -> 1 across the four pool stages).
    x = jax.random.normal(kx, (2, 3, 16, 16), dtype=jnp.float32)
    params = init_params(kp)

    fwd = jax.jit(based_encoder_forward)
    out = jax.block_until_ready(fwd(x, params))

    ref = reference_forward(x, params)
    assert out.shape == (2, 30, 1, 1), out.shape
    tol = 1e-3 if MXU_DTYPE == jnp.float32 else 2.5e-2  # bf16-MXU tolerance if flipped
    np.testing.assert_allclose(np.asarray(out), np.asarray(ref), rtol=tol, atol=tol)
    print("KERNEL_OK")
</pallas_src>

<mosaic_0001>
module attributes {stable_mosaic.version = 11 : i64} {
  func.func @_encoder_kernel(%arg0: memref<512x3xf32, #tpu.memory_space<vmem>>, %arg1: memref<8x128xf32, #tpu.memory_space<vmem>>, %arg2: memref<3x128x128xf32, #tpu.memory_space<vmem>>, %arg3: memref<4x1x128xf32, #tpu.memory_space<vmem>>, %arg4: memref<1x128xf32, #tpu.memory_space<vmem>>, %arg5: memref<2x128xf32, #tpu.memory_space<vmem>>) attributes {dimension_semantics = [], scalar_prefetch = 0 : i64, scratch_operands = 0 : i64, tpu.core_type = #tpu.core_type<tc>} {
    %c0 = arith.constant 0 : index
    %c0_0 = arith.constant 0 : index
    %0 = vector.load %arg0[%c0, %c0_0] : memref<512x3xf32, #tpu.memory_space<vmem>>, vector<512x3xf32>
    %c0_1 = arith.constant 0 : index
    %c0_2 = arith.constant 0 : index
    %1 = vector.load %arg1[%c0_1, %c0_2] : memref<8x128xf32, #tpu.memory_space<vmem>>, vector<8x128xf32>
    %2 = vector.extract_strided_slice %0 {offsets = [0, 0], sizes = [512, 1], strides = [1, 1]} : vector<512x3xf32> to vector<512x1xf32>
    %3 = vector.extract_strided_slice %1 {offsets = [0, 0], sizes = [1, 128], strides = [1, 1]} : vector<8x128xf32> to vector<1x128xf32>
    %4 = vector.broadcast %2 : vector<512x1xf32> to vector<512x128xf32>
    %5 = vector.broadcast %3 : vector<1x128xf32> to vector<512x128xf32>
    %6 = arith.mulf %4, %5 : vector<512x128xf32>
    %7 = vector.extract_strided_slice %0 {offsets = [0, 1], sizes = [512, 1], strides = [1, 1]} : vector<512x3xf32> to vector<512x1xf32>
    %8 = vector.extract_strided_slice %1 {offsets = [1, 0], sizes = [1, 128], strides = [1, 1]} : vector<8x128xf32> to vector<1x128xf32>
    %9 = vector.broadcast %7 : vector<512x1xf32> to vector<512x128xf32>
    %10 = vector.broadcast %8 : vector<1x128xf32> to vector<512x128xf32>
    %11 = arith.mulf %9, %10 : vector<512x128xf32>
    %12 = arith.addf %6, %11 : vector<512x128xf32>
    %13 = vector.extract_strided_slice %0 {offsets = [0, 2], sizes = [512, 1], strides = [1, 1]} : vector<512x3xf32> to vector<512x1xf32>
    %14 = vector.extract_strided_slice %1 {offsets = [2, 0], sizes = [1, 128], strides = [1, 1]} : vector<8x128xf32> to vector<1x128xf32>
    %15 = vector.broadcast %13 : vector<512x1xf32> to vector<512x128xf32>
    %16 = vector.broadcast %14 : vector<1x128xf32> to vector<512x128xf32>
    %17 = arith.mulf %15, %16 : vector<512x128xf32>
    %18 = arith.addf %12, %17 : vector<512x128xf32>
    %19 = vector.extract_strided_slice %18 {offsets = [0, 0], sizes = [128, 128], strides = [1, 1]} : vector<512x128xf32> to vector<128x128xf32>
    %20 = vector.extract_strided_slice %18 {offsets = [128, 0], sizes = [128, 128], strides = [1, 1]} : vector<512x128xf32> to vector<128x128xf32>
    %21 = arith.maximumf %19, %20 : vector<128x128xf32>
    %22 = vector.extract_strided_slice %18 {offsets = [256, 0], sizes = [128, 128], strides = [1, 1]} : vector<512x128xf32> to vector<128x128xf32>
    %23 = vector.extract_strided_slice %18 {offsets = [384, 0], sizes = [128, 128], strides = [1, 1]} : vector<512x128xf32> to vector<128x128xf32>
    %24 = arith.maximumf %22, %23 : vector<128x128xf32>
    %25 = arith.maximumf %21, %24 : vector<128x128xf32>
    %c0_3 = arith.constant 0 : index
    %c0_4 = arith.constant 0 : index
    %c0_5 = arith.constant 0 : index
    %26 = vector.load %arg3[%c0_3, %c0_4, %c0_5] : memref<4x1x128xf32, #tpu.memory_space<vmem>>, vector<1x1x128xf32>
    %27 = vector.shape_cast %26 : vector<1x1x128xf32> to vector<1x128xf32>
    %cst = arith.constant dense<0.000000e+00> : vector<128xf32>
    %28 = vector.multi_reduction <add>, %25, %cst [0] : vector<128x128xf32> to vector<128xf32>
    %29 = vector.shape_cast %28 : vector<128xf32> to vector<1x128xf32>
    %30 = arith.mulf %25, %25 : vector<128x128xf32>
    %cst_6 = arith.constant dense<0.000000e+00> : vector<128xf32>
    %31 = vector.multi_reduction <add>, %30, %cst_6 [0] : vector<128x128xf32> to vector<128xf32>
    %32 = vector.shape_cast %31 : vector<128xf32> to vector<1x128xf32>
    %cst_7 = arith.constant 7.812500e-03 : f32
    %33 = vector.broadcast %cst_7 : f32 to vector<1x128xf32>
    %34 = arith.mulf %29, %33 : vector<1x128xf32>
    %cst_8 = arith.constant 7.812500e-03 : f32
    %35 = vector.broadcast %cst_8 : f32 to vector<1x128xf32>
    %36 = arith.mulf %32, %35 : vector<1x128xf32>
    %37 = arith.mulf %34, %34 : vector<1x128xf32>
    %38 = arith.subf %36, %37 : vector<1x128xf32>
    %cst_9 = arith.constant 0.000000e+00 : f32
    %39 = vector.broadcast %cst_9 : f32 to vector<1x128xf32>
    %40 = arith.maximumf %38, %39 : vector<1x128xf32>
    %cst_10 = arith.constant 9.99999974E-6 : f32
    %41 = vector.broadcast %cst_10 : f32 to vector<1x128xf32>
    %42 = arith.addf %40, %41 : vector<1x128xf32>
    %43 = math.rsqrt %42 : vector<1x128xf32>
    %44 = arith.mulf %27, %43 : vector<1x128xf32>
    %c0_11 = arith.constant 0 : index
    %c0_12 = arith.constant 0 : index
    %c0_13 = arith.constant 0 : index
    %45 = vector.load %arg2[%c0_11, %c0_12, %c0_13] : memref<3x128x128xf32, #tpu.memory_space<vmem>>, vector<1x128x128xf32>
    %46 = vector.shape_cast %45 : vector<1x128x128xf32> to vector<128x128xf32>
    %47 = tpu.transpose %44, [1, 0] : vector<1x128xf32> -> vector<128x1xf32>
    %48 = vector.broadcast %47 : vector<128x1xf32> to vector<128x128xf32>
    %49 = arith.mulf %46, %48 : vector<128x128xf32>
    %cst_14 = arith.constant dense<0.000000e+00> : vector<128x128xf32>
    %50 = tpu.matmul %25, %49, %cst_14 {dimension_numbers = #tpu.dot_dimension_numbers<[1], [0], [0], [1], [0, 0, 1, 1], [], []>} : vector<128x128xf32>, vector<128x128xf32>, vector<128x128xf32> -> vector<128x128xf32>
    %51 = vector.extract_strided_slice %50 {offsets = [0, 0], sizes = [32, 128], strides = [1, 1]} : vector<128x128xf32> to vector<32x128xf32>
    %52 = vector.extract_strided_slice %50 {offsets = [32, 0], sizes = [32, 128], strides = [1, 1]} : vector<128x128xf32> to vector<32x128xf32>
    %53 = arith.maximumf %51, %52 : vector<32x128xf32>
    %54 = vector.extract_strided_slice %50 {offsets = [64, 0], sizes = [32, 128], strides = [1, 1]} : vector<128x128xf32> to vector<32x128xf32>
    %55 = vector.extract_strided_slice %50 {offsets = [96, 0], sizes = [32, 128], strides = [1, 1]} : vector<128x128xf32> to vector<32x128xf32>
    %56 = arith.maximumf %54, %55 : vector<32x128xf32>
    %57 = arith.maximumf %53, %56 : vector<32x128xf32>
    %c1 = arith.constant 1 : index
    %c0_15 = arith.constant 0 : index
    %c0_16 = arith.constant 0 : index
    %58 = vector.load %arg3[%c1, %c0_15, %c0_16] : memref<4x1x128xf32, #tpu.memory_space<vmem>>, vector<1x1x128xf32>
    %59 = vector.shape_cast %58 : vector<1x1x128xf32> to vector<1x128xf32>
    %cst_17 = arith.constant dense<0.000000e+00> : vector<128xf32>
    %60 = vector.multi_reduction <add>, %57, %cst_17 [0] : vector<32x128xf32> to vector<128xf32>
    %61 = vector.shape_cast %60 : vector<128xf32> to vector<1x128xf32>
    %62 = arith.mulf %57, %57 : vector<32x128xf32>
    %cst_18 = arith.constant dense<0.000000e+00> : vector<128xf32>
    %63 = vector.multi_reduction <add>, %62, %cst_18 [0] : vector<32x128xf32> to vector<128xf32>
    %64 = vector.shape_cast %63 : vector<128xf32> to vector<1x128xf32>
    %cst_19 = arith.constant 3.125000e-02 : f32
    %65 = vector.broadcast %cst_19 : f32 to vector<1x128xf32>
    %66 = arith.mulf %61, %65 : vector<1x128xf32>
    %cst_20 = arith.constant 3.125000e-02 : f32
    %67 = vector.broadcast %cst_20 : f32 to vector<1x128xf32>
    %68 = arith.mulf %64, %67 : vector<1x128xf32>
    %69 = arith.mulf %66, %66 : vector<1x128xf32>
    %70 = arith.subf %68, %69 : vector<1x128xf32>
    %cst_21 = arith.constant 0.000000e+00 : f32
    %71 = vector.broadcast %cst_21 : f32 to vector<1x128xf32>
    %72 = arith.maximumf %70, %71 : vector<1x128xf32>
    %cst_22 = arith.constant 9.99999974E-6 : f32
    %73 = vector.broadcast %cst_22 : f32 to vector<1x128xf32>
    %74 = arith.addf %72, %73 : vector<1x128xf32>
    %75 = math.rsqrt %74 : vector<1x128xf32>
    %76 = arith.mulf %59, %75 : vector<1x128xf32>
    %c1_23 = arith.constant 1 : index
    %c0_24 = arith.constant 0 : index
    %c0_25 = arith.constant 0 : index
    %77 = vector.load %arg2[%c1_23, %c0_24, %c0_25] : memref<3x128x128xf32, #tpu.memory_space<vmem>>, vector<1x128x128xf32>
    %78 = vector.shape_cast %77 : vector<1x128x128xf32> to vector<128x128xf32>
    %79 = tpu.transpose %76, [1, 0] : vector<1x128xf32> -> vector<128x1xf32>
    %80 = vector.broadcast %79 : vector<128x1xf32> to vector<128x128xf32>
    %81 = arith.mulf %78, %80 : vector<128x128xf32>
    %cst_26 = arith.constant dense<0.000000e+00> : vector<32x128xf32>
    %82 = tpu.matmul %57, %81, %cst_26 {dimension_numbers = #tpu.dot_dimension_numbers<[1], [0], [0], [1], [0, 0, 1, 1], [], []>} : vector<32x128xf32>, vector<128x128xf32>, vector<32x128xf32> -> vector<32x128xf32>
    %83 = vector.extract_strided_slice %82 {offsets = [0, 0], sizes = [8, 128], strides = [1, 1]} : vector<32x128xf32> to vector<8x128xf32>
    %84 = vector.extract_strided_slice %82 {offsets = [8, 0], sizes = [8, 128], strides = [1, 1]} : vector<32x128xf32> to vector<8x128xf32>
    %85 = arith.maximumf %83, %84 : vector<8x128xf32>
    %86 = vector.extract_strided_slice %82 {offsets = [16, 0], sizes = [8, 128], strides = [1, 1]} : vector<32x128xf32> to vector<8x128xf32>
    %87 = vector.extract_strided_slice %82 {offsets = [24, 0], sizes = [8, 128], strides = [1, 1]} : vector<32x128xf32> to vector<8x128xf32>
    %88 = arith.maximumf %86, %87 : vector<8x128xf32>
    %89 = arith.maximumf %85, %88 : vector<8x128xf32>
    %c2 = arith.constant 2 : index
    %c0_27 = arith.constant 0 : index
    %c0_28 = arith.constant 0 : index
    %90 = vector.load %arg3[%c2, %c0_27, %c0_28] : memref<4x1x128xf32, #tpu.memory_space<vmem>>, vector<1x1x128xf32>
    %91 = vector.shape_cast %90 : vector<1x1x128xf32> to vector<1x128xf32>
    %cst_29 = arith.constant dense<0.000000e+00> : vector<128xf32>
    %92 = vector.multi_reduction <add>, %89, %cst_29 [0] : vector<8x128xf32> to vector<128xf32>
    %93 = vector.shape_cast %92 : vector<128xf32> to vector<1x128xf32>
    %94 = arith.mulf %89, %89 : vector<8x128xf32>
    %cst_30 = arith.constant dense<0.000000e+00> : vector<128xf32>
    %95 = vector.multi_reduction <add>, %94, %cst_30 [0] : vector<8x128xf32> to vector<128xf32>
    %96 = vector.shape_cast %95 : vector<128xf32> to vector<1x128xf32>
    %cst_31 = arith.constant 1.250000e-01 : f32
    %97 = vector.broadcast %cst_31 : f32 to vector<1x128xf32>
    %98 = arith.mulf %93, %97 : vector<1x128xf32>
    %cst_32 = arith.constant 1.250000e-01 : f32
    %99 = vector.broadcast %cst_32 : f32 to vector<1x128xf32>
    %100 = arith.mulf %96, %99 : vector<1x128xf32>
    %101 = arith.mulf %98, %98 : vector<1x128xf32>
    %102 = arith.subf %100, %101 : vector<1x128xf32>
    %cst_33 = arith.constant 0.000000e+00 : f32
    %103 = vector.broadcast %cst_33 : f32 to vector<1x128xf32>
    %104 = arith.maximumf %102, %103 : vector<1x128xf32>
    %cst_34 = arith.constant 9.99999974E-6 : f32
    %105 = vector.broadcast %cst_34 : f32 to vector<1x128xf32>
    %106 = arith.addf %104, %105 : vector<1x128xf32>
    %107 = math.rsqrt %106 : vector<1x128xf32>
    %108 = arith.mulf %91, %107 : vector<1x128xf32>
    %c2_35 = arith.constant 2 : index
    %c0_36 = arith.constant 0 : index
    %c0_37 = arith.constant 0 : index
    %109 = vector.load %arg2[%c2_35, %c0_36, %c0_37] : memref<3x128x128xf32, #tpu.memory_space<vmem>>, vector<1x128x128xf32>
    %110 = vector.shape_cast %109 : vector<1x128x128xf32> to vector<128x128xf32>
    %111 = tpu.transpose %108, [1, 0] : vector<1x128xf32> -> vector<128x1xf32>
    %112 = vector.broadcast %111 : vector<128x1xf32> to vector<128x128xf32>
    %113 = arith.mulf %110, %112 : vector<128x128xf32>
    %cst_38 = arith.constant dense<0.000000e+00> : vector<8x128xf32>
    %114 = tpu.matmul %89, %113, %cst_38 {dimension_numbers = #tpu.dot_dimension_numbers<[1], [0], [0], [1], [0, 0, 1, 1], [], []>} : vector<8x128xf32>, vector<128x128xf32>, vector<8x128xf32> -> vector<8x128xf32>
    %c4_i32 = arith.constant 4 : i32
    %115 = tpu.dynamic_rotate %114 by %c4_i32 dim 0 : vector<8x128xf32>, i32 -> vector<8x128xf32>
    %116 = arith.maximumf %114, %115 : vector<8x128xf32>
    %c6_i32 = arith.constant 6 : i32
    %117 = tpu.dynamic_rotate %116 by %c6_i32 dim 0 : vector<8x128xf32>, i32 -> vector<8x128xf32>
    %118 = arith.maximumf %116, %117 : vector<8x128xf32>
    %119 = vector.extract_strided_slice %118 {offsets = [0, 0], sizes = [2, 128], strides = [1, 1]} : vector<8x128xf32> to vector<2x128xf32>
    %cst_39 = arith.constant dense<0.000000e+00> : vector<128xf32>
    %120 = vector.multi_reduction <add>, %119, %cst_39 [0] : vector<2x128xf32> to vector<128xf32>
    %121 = vector.shape_cast %120 : vector<128xf32> to vector<1x128xf32>
    %cst_40 = arith.constant 2.000000e+00 : f32
    %122 = vector.broadcast %cst_40 : f32 to vector<1x128xf32>
    %123 = arith.divf %121, %122 : vector<1x128xf32>
    %124 = vector.broadcast %123 : vector<1x128xf32> to vector<2x128xf32>
    %125 = arith.subf %119, %124 : vector<2x128xf32>
    %126 = arith.mulf %125, %125 : vector<2x128xf32>
    %cst_41 = arith.constant dense<0.000000e+00> : vector<128xf32>
    %127 = vector.multi_reduction <add>, %126, %cst_41 [0] : vector<2x128xf32> to vector<128xf32>
    %128 = vector.shape_cast %127 : vector<128xf32> to vector<1x128xf32>
    %cst_42 = arith.constant 2.000000e+00 : f32
    %129 = vector.broadcast %cst_42 : f32 to vector<1x128xf32>
    %130 = arith.divf %128, %129 : vector<1x128xf32>
    %c3 = arith.constant 3 : index
    %c0_43 = arith.constant 0 : index
    %c0_44 = arith.constant 0 : index
    %131 = vector.load %arg3[%c3, %c0_43, %c0_44] : memref<4x1x128xf32, #tpu.memory_space<vmem>>, vector<1x1x128xf32>
    %132 = vector.shape_cast %131 : vector<1x1x128xf32> to vector<1x128xf32>
    %cst_45 = arith.constant 9.99999974E-6 : f32
    %133 = vector.broadcast %cst_45 : f32 to vector<1x128xf32>
    %134 = arith.addf %130, %133 : vector<1x128xf32>
    %135 = math.rsqrt %134 : vector<1x128xf32>
    %136 = arith.mulf %132, %135 : vector<1x128xf32>
    %137 = vector.broadcast %136 : vector<1x128xf32> to vector<2x128xf32>
    %138 = arith.mulf %119, %137 : vector<2x128xf32>
    %c0_46 = arith.constant 0 : index
    %c0_47 = arith.constant 0 : index
    %139 = vector.load %arg4[%c0_46, %c0_47] : memref<1x128xf32, #tpu.memory_space<vmem>>, vector<1x128xf32>
    %140 = arith.mulf %123, %136 : vector<1x128xf32>
    %141 = arith.subf %139, %140 : vector<1x128xf32>
    %142 = vector.broadcast %141 : vector<1x128xf32> to vector<2x128xf32>
    %143 = arith.addf %138, %142 : vector<2x128xf32>
    %c0_48 = arith.constant 0 : index
    %c0_49 = arith.constant 0 : index
    %144 = vector.load %arg5[%c0_48, %c0_49] : memref<2x128xf32, #tpu.memory_space<vmem>>, vector<2x128xf32>
    tpu.vector_store %arg5[%c0_48, %c0_49], %143 {strides = array<i32>} : memref<2x128xf32, #tpu.memory_space<vmem>>, vector<2x128xf32>,
    return
  }
}

</mosaic_0001>

<bundles_post_ra>
// kernel: based_encoder_forward.1
= control target key start
LH: loop header
LB: loop body
LE: loop exit
PB: predicated region body
PF: predicated region fallthrough
CT: control target
= control target key end

     0   :  { %v4204_v2 = vmov 0   ;;  %s4194_s0 = inlined_call_operand.vmem [shape: f32[512,3], index: 0, kind: input, shape index: {}]   ;;  %s4195_s1 = inlined_call_operand.vmem [shape: f32[8,128], index: 1, kind: input, shape index: {}]   ;;  %s4196_s2 = inlined_call_operand.vmem [shape: f32[3,128,128], index: 2, kind: input, shape index: {}]   ;;  %s4197_s3 = inlined_call_operand.vmem [shape: f32[4,1,128], index: 3, kind: input, shape index: {}]   ;;  %s4198_s4 = inlined_call_operand.vmem [shape: f32[1,128], index: 4, kind: input, shape index: {}]   ;;  %s4199_s5 = inlined_call_operand.hbm [shape: f32[2,128], index: 5, kind: output, shape index: {}]  }
   0x1   :  { %v37_v0 = vld [vmem:[%s4194_s0 + $0x80] sm:$0xff]  ;;  %2559 = vset.pattern.permute.xlu1 %v4204_v2  ;;  %2558 = vset.pattern.permute.xlu0 %v4204_v2  ;;  %v2690_v3 = vld [vmem:[%s4194_s0 + $0x88] sm:$0xff] }
   0x2   :  { %v2682_v1 = vld [vmem:[%s4194_s0] sm:$0xff]  ;;  %168 = vperm.xlu1 %2559, %v37_v0   ;;  %v2695_v4 = vld [vmem:[%s4194_s0 + $0x8] sm:$0xff] }
   0x3   :  { %88 = vperm.xlu0 %2558, %v2682_v1   ;;  %v2702_v5 = vld [vmem:[%s4194_s0 + $0x108] sm:$0xff]  ;;  %v2707_v6 = vld [vmem:[%s4194_s0 + $0x100] sm:$0xff] }
   0x4   :  { %v2714_v7 = vld [vmem:[%s4194_s0 + $0x188] sm:$0xff]  ;;  %v2719_v8 = vld [vmem:[%s4194_s0 + $0x180] sm:$0xff] }
   0x6   :  { %173 = vperm.xlu1 %2559, %v2690_v3  }
   0x7   :  { %93 = vperm.xlu0 %2558, %v2695_v4  }
   0xa   :  { %253 = vperm.xlu1 %2559, %v2702_v5  }
   0xb   :  { %248 = vperm.xlu0 %2558, %v2707_v6  }
   0xc   :  { %10 = vsyncpa [#allocation3], 0  ;;  %v2726_v9 = vld [vmem:[%s4194_s0 + $0x90] sm:$0xff]  ;;  %v4202_v10 = vmov 1   ;;  %v2734_v11 = vld [vmem:[%s4194_s0 + $0x18] sm:$0xff]  ;;  %v4200_v24 = vmov 2  }
   0xd   :  { %v2740_v12 = vld [vmem:[%s4194_s0 + $0x198] sm:$0xff]  ;;  %v2747_v13 = vld [vmem:[%s4194_s0 + $0xa0] sm:$0xff]  ;;  %v2754_v14 = vld [vmem:[%s4194_s0 + $0x28] sm:$0xff]  ;;  %vm2643_vm0 = vmmov 0   ;;  %vm2173_vm1 = vcmask 1041408   ;;  %s2645_s19 = smov [#allocation2]  }
   0xe   :  { %333 = vperm.xlu1 %2559, %v2714_v7   ;;  %v2759_v15 = vld [vmem:[%s4194_s0 + $0x10] sm:$0xff]  ;;  %v2766_v16 = vld [vmem:[%s4194_s0 + $0x1a8] sm:$0xff]  ;;  %v2787_v20 = vld [vmem:[%s4194_s0 + $0x38] sm:$0xff]  ;;  %s2222_s20 = sshll.u32 %s2645_s19, 4  ;;  %s2223_s20 = int_to_ptr.vmem [resolvable:$true] %s2222_s20 }
   0xf   :  { %328 = vperm.xlu0 %2558, %v2719_v8   ;;  %v55_v17 = vld [vmem:[%s4194_s0 + $0x110] sm:$0xff]  ;;  %v2794_v21 = vld [vmem:[%s4194_s0 + $0x1b8] sm:$0xff]  ;;  %v2802_v22 = vld [vmem:[%s4194_s0 + $0xc0] sm:$0xff]  ;;  %s2615_s21 = scalar_lea.vmem %s2223_s20, 32  ;;  %p2620_p1 = scmp.lt.s32.totalorder %s2223_s20, %s2223_s20 }
  0x10   :  { %v2776_v18 = vld [vmem:[%s4194_s0 + $0xb0] sm:$0xff]  ;;  %v2808_v23 = vld [vmem:[%s4194_s0 + $0x48] sm:$0xff]  ;;  %v2829_v27 = vld [vmem:[%s4194_s0 + $0x58] sm:$0xff]  ;;  %p2616_p0 = scmp.ne.s32.totalorder %s2223_s20, %s2615_s21  ;;  %p2621_p2 = scmp.lt.s32.totalorder %s2615_s21, %s2615_s21 }
  0x11   :  { %v2781_v19 = vld [vmem:[%s4194_s0 + $0x190] sm:$0xff]  ;;  %v2816_v25 = vld [vmem:[%s4194_s0 + $0x1c8] sm:$0xff]  ;;  %v2836_v28 = vld [vmem:[%s4194_s0 + $0x1d8] sm:$0xff] }
  0x12   :  { %2560 = vset.pattern.permute.xlu1 %v4202_v10  ;;  %v2822_v26 = vld [vmem:[%s4194_s0 + $0xd0] sm:$0xff]  ;;  %v2843_v29 = vld [vmem:[%s4194_s0 + $0xe0] sm:$0xff]  ;;  %v2848_v30 = vld [vmem:[%s4194_s0 + $0x98] sm:$0xff]  ;;  %p2622_p3 = por %p2621_p2, %p2620_p1 }
  0x13   :  { %178 = vperm.xlu0 %2558, %v2726_v9   ;;  %479 = vperm.xlu1 %2560, %v2695_v4   ;;  %v2856_v31 = vld [vmem:[%s4194_s0 + $0x68] sm:$0xff]  ;;  %v56_v32 = vld [vmem:[%s4194_s0 + $0x118] sm:$0xff]  ;;  %v2872_v34 = vld [vmem:[%s4194_s0 + $0xf0] sm:$0xff] }
  0x14   :  { %v2865_v33 = vld [vmem:[%s4194_s0 + $0x1e8] sm:$0xff]  ;;  %v2879_v35 = vld [vmem:[%s4194_s0 + $0x78] sm:$0xff]  ;;  %v2897_v37 = vld [vmem:[%s4194_s0 + $0x20] sm:$0xff]  ;;  %p2623_p4 = pnand %p2622_p3, %p2616_p0 }
  0x15   :  { %v2885_v36 = vld [vmem:[%s4194_s0 + $0x1f8] sm:$0xff]  ;;  %v2905_v38 = vld [vmem:[%s4194_s0 + $0x120] sm:$0xff]  ;;  %v2936_v44 = vld [vmem:[%s4194_s0 + $0xa8] sm:$0xff] }
  0x16   :  { %v2912_v39 = vld [vmem:[%s4194_s0 + $0x1a0] sm:$0xff]  ;;  %v2947_v47 = vld [vmem:[%s4194_s0 + $0x30] sm:$0xff]  ;;  %v2968_v53 = vld [vmem:[%s4194_s0 + $0x128] sm:$0xff] }
  0x17   :  { %103 = vperm.xlu0 %2558, %v2734_v11   ;;  %539 = vperm.xlu1 %2560, %v37_v0   ;;  %v2958_v50 = vld [vmem:[%s4194_s0 + $0x1b0] sm:$0xff]  ;;  %v2974_v54 = vld [vmem:[%s4194_s0 + $0xb8] sm:$0xff]  ;;  %v2985_v57 = vld [vmem:[%s4194_s0 + $0x40] sm:$0xff] }
  0x18   :  { %v2997_v60 = vld [vmem:[%s4194_s0 + $0x1c0] sm:$0xff]  ;;  %v3008_v63 = vld [vmem:[%s4194_s0 + $0xc8] sm:$0xff] }
  0x1b   :  { %343 = vperm.xlu0 %2558, %v2740_v12   ;;  %603 = vperm.xlu1 %2560, %v2707_v6  }
  0x1f   :  { %188 = vperm.xlu0 %2558, %v2747_v13   ;;  %667 = vperm.xlu1 %2560, %v2719_v8  }
  0x23   :  { %113 = vperm.xlu0 %2558, %v2754_v14   ;;  %2561 = vset.pattern.permute.xlu1 %v4204_v2 }
  0x24   :  { %98 = vperm.xlu1 %2561, %v2759_v15  }
  0x27   :  { %353 = vperm.xlu0 %2558, %v2766_v16  }
  0x28   :  { %258 = vperm.xlu1 %2561, %v55_v17  }
  0x2b   :  { %198 = vperm.xlu0 %2558, %v2776_v18  }
  0x2c   :  { %338 = vperm.xlu1 %2561, %v2781_v19  }
  0x2f   :  { %123 = vperm.xlu0 %2558, %v2787_v20  }
  0x30   :  { %2562 = vset.pattern.permute.xlu1 %v4202_v10 }
  0x31   :  { %547 = vperm.xlu1 %2562, %v2726_v9  }
  0x33   :  { %363 = vperm.xlu0 %2558, %v2794_v21  }
  0x35   :  { %611 = vperm.xlu1 %2562, %v55_v17  }
  0x37   :  { %208 = vperm.xlu0 %2558, %v2802_v22  }
  0x39   :  { %2563 = vset.pattern.permute.xlu1 %v4200_v24 }
  0x3a   :  { %863 = vperm.xlu1 %2563, %v2682_v1  }
  0x3b   :  { %133 = vperm.xlu0 %2558, %v2808_v23  }
  0x3e   :  { %927 = vperm.xlu1 %2563, %v37_v0  }
  0x3f   :  { %373 = vperm.xlu0 %2558, %v2816_v25  }
  0x42   :  { %931 = vperm.xlu1 %2563, %v2690_v3  }
  0x43   :  { %218 = vperm.xlu0 %2558, %v2822_v26  }
  0x46   :  { %995 = vperm.xlu1 %2563, %v2702_v5  }
  0x47   :  { %143 = vperm.xlu0 %2558, %v2829_v27  }
  0x4a   :  { %1059 = vperm.xlu1 %2563, %v2714_v7  }
  0x4b   :  { %383 = vperm.xlu0 %2558, %v2836_v28  }
  0x4e   :  { %2564 = vset.pattern.permute.xlu1 %v4204_v2 }
  0x4f   :  { %228 = vperm.xlu0 %2558, %v2843_v29   ;;  %183 = vperm.xlu1 %2564, %v2848_v30  }
  0x53   :  { %153 = vperm.xlu0 %2558, %v2856_v31   ;;  %263 = vperm.xlu1 %2564, %v56_v32  }
  0x57   :  { %393 = vperm.xlu0 %2558, %v2865_v33   ;;  %2565 = vset.pattern.permute.xlu1 %v4202_v10 }
  0x58   :  { %487 = vperm.xlu1 %2565, %v2734_v11  }
  0x5b   :  { %238 = vperm.xlu0 %2558, %v2872_v34  }
  0x5c   :  { %615 = vperm.xlu1 %2565, %v56_v32  }
  0x5f   :  { %163 = vperm.xlu0 %2558, %v2879_v35  }
  0x60   :  { %679 = vperm.xlu1 %2565, %v2740_v12  }
  0x63   :  { %403 = vperm.xlu0 %2558, %v2885_v36  }
  0x64   :  { %2566 = vset.pattern.permute.xlu1 %v4200_v24 }
  0x65   :  { %935 = vperm.xlu1 %2566, %v2726_v9   ;;  %v3031_v9 = vld [vmem:[%s4194_s0 + $0x1d0] sm:$0xff] }
  0x67   :  { %2601 = vset.pattern.permute.xlu0 %v4202_v10 }
  0x68   :  { %475 = vperm.xlu0 %2601, %v2682_v1  }
  0x69   :  { %999 = vperm.xlu1 %2566, %v55_v17   ;;  %v3042_v17 = vld [vmem:[%s4194_s0 + $0xd8] sm:$0xff] }
  0x6c   :  { %543 = vperm.xlu0 %2601, %v2690_v3   ;;  %v3019_v3 = vld [vmem:[%s4194_s0 + $0x50] sm:$0xff] }
  0x6d   :  { %2567 = vset.pattern.permute.xlu1 %v4204_v2 }
  0x6e   :  { %108 = vperm.xlu1 %2567, %v2897_v37  }
  0x70   :  { %607 = vperm.xlu0 %2601, %v2702_v5  }
  0x72   :  { %268 = vperm.xlu1 %2567, %v2905_v38  }
  0x74   :  { %671 = vperm.xlu0 %2601, %v2714_v7  }
  0x76   :  { %348 = vperm.xlu1 %2567, %v2912_v39  }
  0x78   :  { %483 = vperm.xlu0 %2601, %v2759_v15  }
  0x7a   :  { %2568 = vset.pattern.permute.xlu1 %v4202_v10 }
  0x7b   :  { %555 = vperm.xlu1 %2568, %v2747_v13  }
  0x7c   :  { %675 = vperm.xlu0 %2601, %v2781_v19  }
  0x7f   :  { %619 = vperm.xlu1 %2568, %v2905_v38  }
  0x80   :  { %551 = vperm.xlu0 %2601, %v2848_v30  }
  0x81   :  { %v2921_v40 = vpop.permute.xlu1 %168 }
  0x82   :  { %v2923_v41 = vpop.permute.xlu0 %88 }
  0x83   :  { %2569 = vset.pattern.permute.xlu1 %v4200_v24 }
  0x84   :  { %491 = vperm.xlu0 %2601, %v2897_v37   ;;  %875 = vperm.xlu1 %2569, %v2734_v11  }
  0x85   :  { %v2928_v42 = vpop.permute.xlu1 %173 }
  0x86   :  { %4216 = vst [vmem:[#allocation5_spill] sm:$0xff] %v2928_v42  ;;  %v2930_v43 = vpop.permute.xlu0 %93 }
  0x87   :  { %4217 = vst [vmem:[#allocation6_spill] sm:$0xff] %v2930_v43  ;;  %v4242_v43 = vmov 0  }
  0x88   :  { %683 = vperm.xlu0 %2601, %v2912_v39   ;;  %1003 = vperm.xlu1 %2569, %v56_v32  }
  0x89   :  { %v2938_v45 = vpop.permute.xlu1 %253 }
  0x8a   :  { %4218 = vst [vmem:[#allocation7_spill] sm:$0xff] %v2938_v45  ;;  %v2940_v46 = vpop.permute.xlu0 %248 }
  0x8c   :  { %559 = vperm.xlu0 %2601, %v2936_v44   ;;  %1067 = vperm.xlu1 %2569, %v2740_v12  }
  0x8d   :  { %v2949_v48 = vpop.permute.xlu1 %333 }
  0x8e   :  { %4219 = vst [vmem:[#allocation8_spill] sm:$0xff] %v2949_v48  ;;  %v2951_v49 = vpop.permute.xlu0 %328 }
  0x90   :  { %499 = vperm.xlu0 %2601, %v2947_v47   ;;  %2570 = vset.pattern.permute.xlu1 %v4204_v2 }
  0x91   :  { %193 = vperm.xlu1 %2570, %v2936_v44  }
  0x92   :  { %v2961_v51 = vpop.permute.xlu0 %178  ;;  %v2963_v52 = vpop.permute.xlu1 %479 }
  0x93   :  { %4220 = vst [vmem:[#allocation9_spill] sm:$0xff] %v2961_v51  ;;  %4221 = vst [vmem:[#allocation10_spill] sm:$0xff] %v2963_v52  ;;  %v4237_v51 = vmov 2  }
  0x94   :  { %691 = vperm.xlu0 %2601, %v2958_v50  }
  0x95   :  { %273 = vperm.xlu1 %2570, %v2968_v53  }
  0x96   :  { %v2977_v55 = vpop.permute.xlu0 %103  ;;  %v2979_v56 = vpop.permute.xlu1 %539 }
  0x97   :  { %4222 = vst [vmem:[#allocation11_spill] sm:$0xff] %v2977_v55  ;;  %v3112_v55 = vld [vmem:[%s4194_s0 + $0xf8] sm:$0xff] }
  0x98   :  { %567 = vperm.xlu0 %2601, %v2974_v54  }
  0x99   :  { %2571 = vset.pattern.permute.xlu1 %v4202_v10  ;;  %v3061_v10 = vld [vmem:[%s4194_s0 + $0x130] sm:$0xff] }
  0x9a   :  { %v2988_v58 = vpop.permute.xlu0 %343  ;;  %v2990_v59 = vpop.permute.xlu1 %603  ;;  %495 = vperm.xlu1 %2571, %v2754_v14  }
  0x9b   :  { %4223 = vst [vmem:[#allocation12_spill] sm:$0xff] %v2988_v58 }
  0x9c   :  { %507 = vperm.xlu0 %2601, %v2985_v57  }
  0x9e   :  { %v2999_v61 = vpop.permute.xlu0 %188  ;;  %v3001_v62 = vpop.permute.xlu1 %667  ;;  %623 = vperm.xlu1 %2571, %v2968_v53  }
  0x9f   :  { %4224 = vst [vmem:[#allocation13_spill] sm:$0xff] %v2999_v61 }
  0xa0   :  { %699 = vperm.xlu0 %2601, %v2997_v60  }
  0xa2   :  { %v3010_v0 = vpop.permute.xlu0 %113  ;;  %687 = vperm.xlu1 %2571, %v2766_v16  }
  0xa3   :  { %4225 = vst [vmem:[#allocation14_spill] sm:$0xff] %v3010_v0  ;;  %v3013_v1 = vpop.permute.xlu1 %98  ;;  %v3101_v0 = vld [vmem:[%s4194_s0 + $0x1f0] sm:$0xff] }
  0xa4   :  { %4226 = vst [vmem:[#allocation15_spill] sm:$0xff] %v3013_v1  ;;  %575 = vperm.xlu0 %2601, %v3008_v63  }
  0xa6   :  { %v3021_v5 = vpop.permute.xlu0 %353  ;;  %2572 = vset.pattern.permute.xlu1 %v4200_v24 }
  0xa7   :  { %4227 = vst [vmem:[#allocation16_spill] sm:$0xff] %v3021_v5  ;;  %v3024_v7 = vpop.permute.xlu1 %258  ;;  %943 = vperm.xlu1 %2572, %v2747_v13  }
  0xa8   :  { %4228 = vst [vmem:[#allocation17_spill] sm:$0xff] %v3024_v7  ;;  %515 = vperm.xlu0 %2601, %v3019_v3  }
  0xaa   :  { %v3033_v11 = vpop.permute.xlu0 %198 }
  0xab   :  { %4229 = vst [vmem:[#allocation18_spill] sm:$0xff] %v3033_v11  ;;  %v3035_v12 = vpop.permute.xlu1 %338  ;;  %1007 = vperm.xlu1 %2572, %v2905_v38   ;;  %v3054_v38 = vld [vmem:[%s4194_s0 + $0x60] sm:$0xff] }
  0xac   :  { %4230 = vst [vmem:[#allocation19_spill] sm:$0xff] %v3035_v12  ;;  %707 = vperm.xlu0 %2601, %v3031_v9  }
  0xae   :  { %v3044_v13 = vpop.permute.xlu0 %123 }
  0xaf   :  { %4231 = vst [vmem:[#allocation20_spill] sm:$0xff] %v3044_v13  ;;  %2573 = vset.pattern.permute.xlu1 %v4204_v2  ;;  %v3070_v13 = vld [vmem:[%s4194_s0 + $0x1e0] sm:$0xff] }
  0xb0   :  { %583 = vperm.xlu0 %2601, %v3042_v17   ;;  %v3048_v32 = vpop.permute.xlu1 %547  ;;  %118 = vperm.xlu1 %2573, %v2947_v47  }
  0xb1   :  { %4232 = vst [vmem:[#allocation21_spill] sm:$0xff] %v3048_v32  ;;  %v3090_v32 = vld [vmem:[%s4194_s0 + $0x70] sm:$0xff] }
  0xb2   :  { %v3056_v24 = vpop.permute.xlu0 %363 }
  0xb3   :  { %4233 = vst [vmem:[#allocation22_spill] sm:$0xff] %v3056_v24  ;;  %v3079_v24 = vld [vmem:[%s4194_s0 + $0xe8] sm:$0xff] }
  0xb4   :  { %523 = vperm.xlu0 %2601, %v3054_v38   ;;  %v3064_v2 = vpop.permute.xlu1 %611  ;;  %278 = vperm.xlu1 %2573, %v3061_v10  }
  0xb5   :  { %4234 = vst [vmem:[#allocation23_spill] sm:$0xff] %v3064_v2  ;;  %v4235_v2 = vmov 1  }
  0xb6   :  { %v3072_v12 = vpop.permute.xlu0 %208 }
  0xb8   :  { %715 = vperm.xlu0 %2601, %v3070_v13   ;;  %358 = vperm.xlu1 %2573, %v2958_v50  }
  0xb9   :  { %v3081_v11 = vpop.permute.xlu1 %863 }
  0xba   :  { %v3083_v7 = vpop.permute.xlu0 %133 }
  0xbc   :  { %591 = vperm.xlu0 %2601, %v3079_v24   ;;  %2574 = vset.pattern.permute.xlu1 %v4235_v2 }
  0xbd   :  { %563 = vperm.xlu1 %2574, %v2776_v18   ;;  %v3093_v5 = vpop.permute.xlu1 %927 }
  0xbe   :  { %v3095_v1 = vpop.permute.xlu0 %373 }
  0xc0   :  { %531 = vperm.xlu0 %2601, %v3090_v32  }
  0xc1   :  { %627 = vperm.xlu1 %2574, %v3061_v10   ;;  %v3104_v61 = vpop.permute.xlu1 %931 }
  0xc2   :  { %4236 = vst [vmem:[#allocation24_spill] sm:$0xff] %v3104_v61  ;;  %v3106_v58 = vpop.permute.xlu0 %218 }
  0xc4   :  { %723 = vperm.xlu0 %2601, %v3101_v0  }
  0xc5   :  { %2575 = vset.pattern.permute.xlu1 %v4237_v51  ;;  %v3115_v48 = vpop.permute.xlu1 %995 }
  0xc6   :  { %4238 = vst [vmem:[#allocation25_spill] sm:$0xff] %v3115_v48  ;;  %v3117_v45 = vpop.permute.xlu0 %143  ;;  %883 = vperm.xlu1 %2575, %v2754_v14  }
  0xc8   :  { %599 = vperm.xlu0 %2601, %v3112_v55  }
  0xc9   :  { %v3121_v61 = vpop.permute.xlu1 %1059 }
  0xca   :  { %4239 = vst [vmem:[#allocation26_spill] sm:$0xff] %v3121_v61  ;;  %v3123_v42 = vpop.permute.xlu0 %383  ;;  %1011 = vperm.xlu1 %2575, %v2968_v53  }
  0xcc   :  { %2603 = vset.pattern.permute.xlu0 %v4237_v51 }
  0xcd   :  { %867 = vperm.xlu0 %2603, %v2695_v4   ;;  %v60_v4 = vld [vmem:[%s4194_s0 + $0x138] sm:$0xff] }
  0xce   :  { %v3128_v52 = vpop.permute.xlu0 %228  ;;  %1075 = vperm.xlu1 %2575, %v2766_v16   ;;  %v3131_v48 = vpop.permute.xlu1 %183 }
  0xcf   :  { %4240 = vst [vmem:[#allocation27_spill] sm:$0xff] %v3131_v48 }
  0xd1   :  { %991 = vperm.xlu0 %2603, %v2707_v6  }
  0xd2   :  { %v3134_v14 = vpop.permute.xlu0 %153  ;;  %2576 = vset.pattern.permute.xlu1 %v4242_v43  ;;  %v3137_v61 = vpop.permute.xlu1 %263 }
  0xd3   :  { %4241 = vst [vmem:[#allocation28_spill] sm:$0xff] %v3134_v14  ;;  %4243 = vst [vmem:[#allocation29_spill] sm:$0xff] %v3137_v61  ;;  %203 = vperm.xlu1 %2576, %v2974_v54  }
  0xd5   :  { %1055 = vperm.xlu0 %2603, %v2719_v8  }
  0xd6   :  { %v3144_v53 = vpop.permute.xlu0 %393 }
  0xd7   :  { %4244 = vst [vmem:[#allocation30_spill] sm:$0xff] %v3144_v53  ;;  %283 = vperm.xlu1 %2576, %v60_v4   ;;  %v3146_v16 = vpop.permute.xlu1 %487 }
  0xd8   :  { %4245 = vst [vmem:[#allocation31_spill] sm:$0xff] %v3146_v16 }
  0xd9   :  { %871 = vperm.xlu0 %2603, %v2759_v15  }
  0xda   :  { %v3149_v6 = vpop.permute.xlu0 %238 }
  0xdb   :  { %4246 = vst [vmem:[#allocation32_spill] sm:$0xff] %v3149_v6  ;;  %2577 = vset.pattern.permute.xlu1 %v4235_v2  ;;  %v3152_v14 = vpop.permute.xlu1 %615 }
  0xdc   :  { %4247 = vst [vmem:[#allocation33_spill] sm:$0xff] %v3152_v14  ;;  %503 = vperm.xlu1 %2577, %v2787_v20  }
  0xdd   :  { %1063 = vperm.xlu0 %2603, %v2781_v19  }
  0xde   :  { %v3156_v8 = vpop.permute.xlu0 %163 }
  0xdf   :  { %4248 = vst [vmem:[#allocation34_spill] sm:$0xff] %v3156_v8  ;;  %v3158_v48 = vpop.permute.xlu1 %679 }
  0xe0   :  { %4249 = vst [vmem:[#allocation35_spill] sm:$0xff] %v3158_v48  ;;  %631 = vperm.xlu1 %2577, %v60_v4  }
  0xe1   :  { %939 = vperm.xlu0 %2603, %v2848_v30  }
  0xe2   :  { %v3161_v53 = vpop.permute.xlu0 %403 }
  0xe3   :  { %4250 = vst [vmem:[#allocation36_spill] sm:$0xff] %v3161_v53 }
  0xe4   :  { %695 = vperm.xlu1 %2577, %v2794_v21   ;;  %v3164_v15 = vpop.permute.xlu1 %935 }
  0xe5   :  { %4251 = vst [vmem:[#allocation37_spill] sm:$0xff] %v3164_v15  ;;  %879 = vperm.xlu0 %2603, %v2897_v37  }
  0xe7   :  { %v3167_v6 = vpop.permute.xlu0 %475 }
  0xe8   :  { %2578 = vset.pattern.permute.xlu1 %v4237_v51  ;;  %v3170_v19 = vpop.permute.xlu1 %999 }
  0xe9   :  { %4252 = vst [vmem:[#allocation38_spill] sm:$0xff] %v3170_v19  ;;  %1071 = vperm.xlu0 %2603, %v2912_v39   ;;  %951 = vperm.xlu1 %2578, %v2776_v18   ;;  %v61_v18 = vld [vmem:[%s4194_s0 + $0x140] sm:$0xff] }
  0xeb   :  { %v3174_v8 = vpop.permute.xlu0 %543 }
  0xed   :  { %947 = vperm.xlu0 %2603, %v2936_v44   ;;  %1015 = vperm.xlu1 %2578, %v3061_v10   ;;  %v3178_v30 = vpop.permute.xlu1 %108 }
  0xee   :  { %4253 = vst [vmem:[#allocation39_spill] sm:$0xff] %v3178_v30 }
  0xef   :  { %v3180_v53 = vpop.permute.xlu0 %607 }
  0xf0   :  { %4254 = vst [vmem:[#allocation40_spill] sm:$0xff] %v3180_v53 }
  0xf1   :  { %887 = vperm.xlu0 %2603, %v2947_v47   ;;  %2579 = vset.pattern.permute.xlu1 %v4242_v43  ;;  %v3184_v37 = vpop.permute.xlu1 %268 }
  0xf2   :  { %4255 = vst [vmem:[#allocation41_spill] sm:$0xff] %v3184_v37  ;;  %128 = vperm.xlu1 %2579, %v2985_v57  }
  0xf3   :  { %v3187_v39 = vpop.permute.xlu0 %671 }
  0xf5   :  { %1079 = vperm.xlu0 %2603, %v2958_v50   ;;  %v3193_v10 = vpop.permute.xlu1 %348 }
  0xf6   :  { %4256 = vst [vmem:[#allocation42_spill] sm:$0xff] %v3193_v10  ;;  %288 = vperm.xlu1 %2579, %v61_v18  }
  0xf7   :  { %v3195_v44 = vpop.permute.xlu0 %483 }
  0xf8   :  { %4257 = vst [vmem:[#allocation43_spill] sm:$0xff] %v3195_v44 }
  0xf9   :  { %955 = vperm.xlu0 %2603, %v2974_v54  }
  0xfa   :  { %368 = vperm.xlu1 %2579, %v2997_v60   ;;  %v3199_v47 = vpop.permute.xlu1 %555 }
  0xfb   :  { %4258 = vst [vmem:[#allocation44_spill] sm:$0xff] %v3199_v47  ;;  %v3201_v37 = vpop.permute.xlu0 %675 }
  0xfc   :  { %4259 = vst [vmem:[#allocation45_spill] sm:$0xff] %v3201_v37 }
  0xfd   :  { %895 = vperm.xlu0 %2603, %v2985_v57  }
  0xfe   :  { %2580 = vset.pattern.permute.xlu1 %v4235_v2  ;;  %v3205_v30 = vpop.permute.xlu1 %619 }
  0xff   :  { %4260 = vst [vmem:[#allocation46_spill] sm:$0xff] %v3205_v30  ;;  %v3207_v50 = vpop.permute.xlu0 %551  ;;  %571 = vperm.xlu1 %2580, %v2802_v22  }
 0x100   :  { %4261 = vst [vmem:[#allocation47_spill] sm:$0xff] %v3207_v50 }
 0x101   :  { %1087 = vperm.xlu0 %2603, %v2997_v60  }
 0x103   :  { %v3211_v10 = vpop.permute.xlu0 %491  ;;  %635 = vperm.xlu1 %2580, %v61_v18   ;;  %v3213_v54 = vpop.permute.xlu1 %875 }
 0x104   :  { %4262 = vst [vmem:[#allocation48_spill] sm:$0xff] %v3211_v10  ;;  %4263 = vst [vmem:[#allocation49_spill] sm:$0xff] %v3213_v54 }
 0x105   :  { %963 = vperm.xlu0 %2603, %v3008_v63  }
 0x107   :  { %v3216_v37 = vpop.permute.xlu0 %683  ;;  %2581 = vset.pattern.permute.xlu1 %v4237_v51  ;;  %v3219_v57 = vpop.permute.xlu1 %1003 }
 0x108   :  { %4264 = vst [vmem:[#allocation50_spill] sm:$0xff] %v3216_v37  ;;  %4265 = vst [vmem:[#allocation51_spill] sm:$0xff] %v3219_v57  ;;  %891 = vperm.xlu1 %2581, %v2787_v20  }
 0x109   :  { %903 = vperm.xlu0 %2603, %v3019_v3  }
 0x10b   :  { %v3223_v50 = vpop.permute.xlu0 %559  ;;  %v3225_v60 = vpop.permute.xlu1 %1067 }
 0x10c   :  { %4266 = vst [vmem:[#allocation52_spill] sm:$0xff] %v3223_v50  ;;  %4267 = vst [vmem:[#allocation53_spill] sm:$0xff] %v3225_v60  ;;  %1019 = vperm.xlu1 %2581, %v60_v4  }
 0x10d   :  { %1095 = vperm.xlu0 %2603, %v3031_v9  }
 0x10f   :  { %v3228_v54 = vpop.permute.xlu0 %499 }
 0x110   :  { %4268 = vst [vmem:[#allocation54_spill] sm:$0xff] %v3228_v54  ;;  %1083 = vperm.xlu1 %2581, %v2794_v21   ;;  %v3231_v37 = vpop.permute.xlu1 %193  ;;  %v3246_v21 = vld [vmem:[%s4194_s0 + $0x148] sm:$0xff] }
 0x111   :  { %4269 = vst [vmem:[#allocation55_spill] sm:$0xff] %v3231_v37  ;;  %971 = vperm.xlu0 %2603, %v3042_v17  }
 0x113   :  { %v3234_v10 = vpop.permute.xlu0 %691 }
 0x114   :  { %4270 = vst [vmem:[#allocation56_spill] sm:$0xff] %v3234_v10  ;;  %2582 = vset.pattern.permute.xlu1 %v4242_v43  ;;  %v3237_v20 = vpop.permute.xlu1 %273 }
 0x115   :  { %4271 = vst [vmem:[#allocation57_spill] sm:$0xff] %v3237_v20  ;;  %911 = vperm.xlu0 %2603, %v3054_v38   ;;  %213 = vperm.xlu1 %2582, %v3008_v63  }
 0x117   :  { %v3241_v4 = vpop.permute.xlu0 %567 }
 0x118   :  { %4272 = vst [vmem:[#allocation58_spill] sm:$0xff] %v3241_v4 }
 0x119   :  { %1103 = vperm.xlu0 %2603, %v3070_v13   ;;  %293 = vperm.xlu1 %2582, %v3246_v21   ;;  %v3250_v10 = vpop.permute.xlu1 %495 }
 0x11a   :  { %4273 = vst [vmem:[#allocation59_spill] sm:$0xff] %v3250_v10 }
 0x11b   :  { %v3252_v54 = vpop.permute.xlu0 %507 }
 0x11d   :  { %979 = vperm.xlu0 %2603, %v3079_v24   ;;  %2583 = vset.pattern.permute.xlu1 %v4235_v2  ;;  %v3256_v63 = vpop.permute.xlu1 %623 }
 0x11e   :  { %4274 = vst [vmem:[#allocation60_spill] sm:$0xff] %v3256_v63  ;;  %511 = vperm.xlu1 %2583, %v2808_v23  }
 0x11f   :  { %v3259_v4 = vpop.permute.xlu0 %699 }
 0x121   :  { %919 = vperm.xlu0 %2603, %v3090_v32   ;;  %v3262_v20 = vpop.permute.xlu1 %687 }
 0x122   :  { %4275 = vst [vmem:[#allocation61_spill] sm:$0xff] %v3262_v20  ;;  %639 = vperm.xlu1 %2583, %v3246_v21  }
 0x123   :  { %v3265_v37 = vpop.permute.xlu0 %575 }
 0x125   :  { %1111 = vperm.xlu0 %2603, %v3101_v0  }
 0x126   :  { %703 = vperm.xlu1 %2583, %v2816_v25   ;;  %v3269_v10 = vpop.permute.xlu1 %943 }
 0x127   :  { %4276 = vst [vmem:[#allocation62_spill] sm:$0xff] %v3269_v10  ;;  %v3271_v50 = vpop.permute.xlu0 %515 }
 0x129   :  { %987 = vperm.xlu0 %2603, %v3112_v55  }
 0x12a   :  { %2584 = vset.pattern.permute.xlu1 %v4237_v51  ;;  %v3275_v63 = vpop.permute.xlu1 %1007 }
 0x12b   :  { %4277 = vst [vmem:[#allocation63_spill] sm:$0xff] %v3275_v63  ;;  %v3277_v57 = vpop.permute.xlu0 %707  ;;  %959 = vperm.xlu1 %2584, %v2802_v22   ;;  %v3295_v22 = vld [vmem:[%s4194_s0 + $0x150] sm:$0xff] }
 0x12d   :  { %1115 = vperm.xlu0 %2603, %v2885_v36  }
 0x12f   :  { %v3281_v20 = vpop.permute.xlu0 %583  ;;  %1023 = vperm.xlu1 %2584, %v61_v18   ;;  %v3283_v30 = vpop.permute.xlu1 %118 }
 0x130   :  { %4278 = vst [vmem:[#allocation64_spill] sm:$0xff] %v3283_v30 }
 0x131   :  { %2605 = vset.pattern.permute.xlu0 %v4242_v43 }
 0x133   :  { %v3286_v10 = vpop.permute.xlu0 %523  ;;  %2585 = vset.pattern.permute.xlu1 %v4242_v43  ;;  %v3289_v47 = vpop.permute.xlu1 %278 }
 0x134   :  { %4279 = vst [vmem:[#allocation65_spill] sm:$0xff] %v3289_v47  ;;  %138 = vperm.xlu1 %2585, %v3019_v3   ;;  %v406_v47 = vlaneseq }
 0x136   :  { %v407_v61 = vshrl.u32 %v406_v47, 7 }
 0x137   :  { %v3297_v63 = vpop.permute.xlu0 %715  ;;  %v3299_v18 = vpop.permute.xlu1 %358 }
 0x138   :  { %4280 = vst [vmem:[#allocation66_spill] sm:$0xff] %v3299_v18  ;;  %298 = vperm.xlu1 %2585, %v3295_v22   ;;  %v1120_v15 = vsub.s32 2, %v407_v61 }
 0x13b   :  { %v3302_v30 = vpop.permute.xlu0 %591 }
 0x13c   :  { %4281 = vst [vmem:[#allocation67_spill] sm:$0xff] %v3302_v30  ;;  %378 = vperm.xlu1 %2585, %v3031_v9   ;;  %v3305_v44 = vpop.permute.xlu1 %563  ;;  %v3318_v30 = vsub.s32 0, %v407_v61  ;;  %v732_v9 = vsub.s32 1, %v407_v61 }
 0x13d   :  { %4282 = vst [vmem:[#allocation68_spill] sm:$0xff] %v3305_v44 }
 0x13e   :  { %4287 = vst [vmem:[#allocation73_spill] sm:$0xff] %v3318_v30 }
 0x13f   :  { %v3307_v60 = vpop.permute.xlu0 %531 }
 0x140   :  { %4283 = vst [vmem:[#allocation69_spill] sm:$0xff] %v3307_v60  ;;  %2586 = vset.pattern.permute.xlu1 %v4235_v2  ;;  %v3310_v3 = vpop.permute.xlu1 %627  ;;  %v85_v60 = vld [vmem:[%s4195_s1] sm:$0xff] }
 0x141   :  { %4284 = vst [vmem:[#allocation70_spill] sm:$0xff] %v3310_v3  ;;  %579 = vperm.xlu1 %2586, %v2822_v26   ;;  %v3329_v47 = vrot.slane %v85_v60, %v3318_v30  ;;  %v3342_v16 = vrot.slane %v85_v60, %v1120_v15 }
 0x143   :  { %v3313_v19 = vpop.permute.xlu0 %723  ;;  %v458_v30 = vmul.f32 %v3329_v47, %v2951_v49 }
 0x144   :  { %4285 = vst [vmem:[#allocation71_spill] sm:$0xff] %v3313_v19  ;;  %v3331_v19 = vrot.slane %v85_v60, %v732_v9  ;;  %v442_v9 = vmul.f32 %v3329_v47, %v2940_v46  ;;  %v426_v60 = vmul.f32 %v3329_v47, %v2921_v40  ;;  %v1122_v46 = vmul.f32 %v3342_v16, %v3081_v11 }
 0x145   :  { %643 = vperm.xlu1 %2586, %v3295_v22   ;;  %v3316_v18 = vpop.permute.xlu1 %883 }
 0x146   :  { %4286 = vst [vmem:[#allocation72_spill] sm:$0xff] %v3316_v18  ;;  %v734_v48 = vmul.f32 %v3331_v19, %v3167_v6  ;;  %v782_v6 = vmul.f32 %v3331_v19, %v3001_v62 }
 0x147   :  { %v3320_v44 = vpop.permute.xlu0 %599 }
 0x148   :  { %4288 = vst [vmem:[#allocation74_spill] sm:$0xff] %v3320_v44  ;;  %v410_v44 = vmul.f32 %v3329_v47, %v2923_v41  ;;  %v766_v41 = vmul.f32 %v3331_v19, %v2990_v59  ;;  %v846_v62 = vadd.f32 %v782_v6, %v458_v30 }
 0x149   :  { %2587 = vset.pattern.permute.xlu1 %v4237_v51  ;;  %v3326_v3 = vpop.permute.xlu1 %1011 }
 0x14a   :  { %4289 = vst [vmem:[#allocation75_spill] sm:$0xff] %v3326_v3  ;;  %899 = vperm.xlu1 %2587, %v2808_v23   ;;  %v750_v23 = vmul.f32 %v3331_v19, %v2979_v56  ;;  %v798_v15 = vadd.f32 %v734_v48, %v410_v44  ;;  %v1138_v56 = vmul.f32 %v3342_v16, %v3093_v5 }
 0x14c   :  { %v3334_v18 = vpop.permute.xlu0 %867  ;;  %v814_v59 = vadd.f32 %v750_v23, %v426_v60  ;;  %v1186_v48 = vadd.f32 %v1122_v46, %v798_v15  ;;  %v3401_v15 = vld [vmem:[%s4194_s0 + $0x160] sm:$0xff] }
 0x14d   :  { %4290 = vst [vmem:[#allocation76_spill] sm:$0xff] %v3334_v18  ;;  %v3340_v14 = vpop.permute.xlu1 %1075 }
 0x14e   :  { %4291 = vst [vmem:[#allocation77_spill] sm:$0xff] %v3340_v14  ;;  %1027 = vperm.xlu1 %2587, %v3246_v21   ;;  %v830_v14 = vadd.f32 %v766_v41, %v442_v9  ;;  %v1202_v40 = vadd.f32 %v1138_v56, %v814_v59 }
 0x150   :  { %v992_v61 = vpop.permute.xlu0 %991  ;;  %v1250_v23 = vmax.f32 %v1186_v48, %v1202_v40 }
 0x151   :  { %v1154_v21 = vmul.f32 %v3342_v16, %v992_v61 }
 0x152   :  { %1091 = vperm.xlu1 %2587, %v2816_v25   ;;  %v3363_v49 = vpop.permute.xlu1 %203  ;;  %v64_v25 = vld [vmem:[%s4194_s0 + $0x158] sm:$0xff] }
 0x153   :  { %4292 = vst [vmem:[#allocation78_spill] sm:$0xff] %v3363_v49  ;;  %v1218_v18 = vadd.f32 %v1154_v21, %v830_v14 }
 0x154   :  { %v1056_v3 = vpop.permute.xlu0 %1055 }
 0x155   :  { %v1170_v44 = vmul.f32 %v3342_v16, %v1056_v3 }
 0x156   :  { %2588 = vset.pattern.permute.xlu1 %v4242_v43  ;;  %v3367_v11 = vpop.permute.xlu1 %283 }
 0x157   :  { %v1234_v53 = vadd.f32 %v1170_v44, %v846_v62  ;;  %4293 = vst [vmem:[#allocation79_spill] sm:$0xff] %v3367_v11  ;;  %223 = vperm.xlu1 %2588, %v3042_v17  }
 0x158   :  { %v3391_v3 = vpop.permute.xlu0 %871 }
 0x159   :  { %v1266_v5 = vmax.f32 %v1218_v18, %v1234_v53 }
 0x15b   :  { %v3373_v9 = vmax.f32 %v1250_v23, %v1266_v5  ;;  %303 = vperm.xlu1 %2588, %v64_v25   ;;  %v3375_v30 = vpop.permute.xlu1 %503 }
 0x15c   :  { %4295 = vst [vmem:[#allocation81_spill] sm:$0xff] %v3375_v30  ;;  %v3394_v41 = vpop.permute.xlu0 %1063 }
 0x15d   :  { %4294 = vst [vmem:[#allocation80_spill] sm:$0xff] %v3373_v9  ;;  %2366 = vmatprep.mubr.f32.mxu0 %v3373_v9 }
 0x15f   :  { %2589 = vset.pattern.permute.xlu1 %v4235_v2  ;;  %v3379_v14 = vpop.permute.xlu1 %631 }
 0x160   :  { %4296 = vst [vmem:[#allocation82_spill] sm:$0xff] %v3379_v14  ;;  %519 = vperm.xlu1 %2589, %v2829_v27   ;;  %v3403_v46 = vpop.permute.xlu0 %939 }
 0x163   :  { %v3382_v17 = vpop.permute.xlu1 %695 }
 0x164   :  { %4297 = vst [vmem:[#allocation83_spill] sm:$0xff] %v3382_v17  ;;  %647 = vperm.xlu1 %2589, %v64_v25  }
 0x168   :  { %711 = vperm.xlu1 %2589, %v2836_v28   ;;  %v3385_v53 = vpop.permute.xlu1 %951 }
 0x169   :  { %4298 = vst [vmem:[#allocation84_spill] sm:$0xff] %v3385_v53  ;;  %v434_v53 = vmul.f32 %v3329_v47, %v3072_v12 }
 0x16c   :  { %2590 = vset.pattern.permute.xlu1 %v4237_v51  ;;  %v3388_v18 = vpop.permute.xlu1 %1015 }
 0x16d   :  { %4299 = vst [vmem:[#allocation85_spill] sm:$0xff] %v3388_v18  ;;  %967 = vperm.xlu1 %2590, %v2822_v26   ;;  %v790_v18 = vmul.f32 %v3331_v19, %v3259_v4 }
 0x171   :  { %1031 = vperm.xlu1 %2590, %v3295_v22   ;;  %v129_v61 = vpop.permute.xlu1 %128  ;;  %v3407_v22 = vpop.permute.xlu0 %879 }
 0x172   :  { %4300 = vst [vmem:[#allocation86_spill] sm:$0xff] %v3407_v22 }
 0x175   :  { %2591 = vset.pattern.permute.xlu1 %v4242_v43  ;;  %v289_v6 = vpop.permute.xlu1 %288 }
 0x176   :  { %148 = vperm.xlu1 %2591, %v3054_v38   ;;  %v3411_v38 = vpop.permute.xlu0 %1071  ;;  %v450_v12 = vmul.f32 %v3329_v47, %v289_v6  ;;  %v744_v6 = vmul.f32 %v3331_v19, %v3271_v50  ;;  %v3483_v50 = vld [vmem:[%s4194_s0 + $0x170] sm:$0xff] }
 0x179   :  { %v369_v60 = vpop.permute.xlu1 %368 }
 0x17a   :  { %308 = vperm.xlu1 %2591, %v3401_v15   ;;  %v3419_v62 = vpop.permute.xlu0 %947  ;;  %v466_v14 = vmul.f32 %v3329_v47, %v369_v60 }
 0x17b   :  { %4303 = vst [vmem:[#allocation89_spill] sm:$0xff] %v3419_v62 }
 0x17c   :  { %v854_v49 = vadd.f32 %v790_v18, %v466_v14 }
 0x17e   :  { %388 = vperm.xlu1 %2591, %v3070_v13   ;;  %v572_v26 = vpop.permute.xlu1 %571  ;;  %v3424_v48 = vpop.permute.xlu0 %887 }
 0x17f   :  { %4305 = vst [vmem:[#allocation91_spill] sm:$0xff] %v3424_v48 }
 0x182   :  { %2592 = vset.pattern.permute.xlu1 %v4235_v2  ;;  %v636_v56 = vpop.permute.xlu1 %635  ;;  %v3429_v40 = vpop.permute.xlu0 %1079 }
 0x183   :  { %587 = vperm.xlu1 %2592, %v2843_v29   ;;  %4306 = vst [vmem:[#allocation92_spill] sm:$0xff] %v3429_v40  ;;  %v774_v40 = vmul.f32 %v3331_v19, %v636_v56 }
 0x185   :  { %v838_v62 = vadd.f32 %v774_v40, %v450_v12 }
 0x187   :  { %651 = vperm.xlu1 %2592, %v3401_v15   ;;  %v3414_v21 = vpop.permute.xlu1 %891 }
 0x188   :  { %4301 = vst [vmem:[#allocation87_spill] sm:$0xff] %v3414_v21 }
 0x18b   :  { %2593 = vset.pattern.permute.xlu1 %v4237_v51  ;;  %v3417_v59 = vpop.permute.xlu1 %1019 }
 0x18c   :  { %4302 = vst [vmem:[#allocation88_spill] sm:$0xff] %v3417_v59  ;;  %907 = vperm.xlu1 %2593, %v2829_v27   ;;  %v3438_v27 = vld [vmem:[%s4194_s0 + $0x168] sm:$0xff] }
 0x18f   :  { %v3422_v13 = vpop.permute.xlu1 %1083 }
 0x190   :  { %4304 = vst [vmem:[#allocation90_spill] sm:$0xff] %v3422_v13  ;;  %1035 = vperm.xlu1 %2593, %v64_v25   ;;  %v742_v13 = vmul.f32 %v3331_v19, %v3252_v54 }
 0x194   :  { %1099 = vperm.xlu1 %2593, %v2836_v28   ;;  %v3427_v44 = vpop.permute.xlu1 %213  ;;  %v3443_v28 = vpop.permute.xlu0 %955 }
 0x195   :  { %4307 = vst [vmem:[#allocation93_spill] sm:$0xff] %v3443_v28  ;;  %v418_v28 = vmul.f32 %v3329_v47, %v129_v61 }
 0x197   :  { %v806_v17 = vadd.f32 %v742_v13, %v418_v28  ;;  %v759_v28 = vmul.f32 %v3331_v19, %v3265_v37 }
 0x198   :  { %2594 = vset.pattern.permute.xlu1 %v4242_v43  ;;  %v3432_v5 = vpop.permute.xlu1 %293  ;;  %v896_v59 = vpop.permute.xlu0 %895 }
 0x199   :  { %233 = vperm.xlu1 %2594, %v3079_v24   ;;  %v758_v24 = vmul.f32 %v3331_v19, %v572_v26  ;;  %v1130_v11 = vmul.f32 %v3342_v16, %v896_v59 }
 0x19b   :  { %v822_v54 = vadd.f32 %v758_v24, %v434_v53  ;;  %v1194_v56 = vadd.f32 %v1130_v11, %v806_v17  ;;  %v792_v11 = vmul.f32 %v3331_v19, %v3277_v57 }
 0x19c   :  { %v1088_v48 = vpop.permute.xlu0 %1087 }
 0x19d   :  { %313 = vperm.xlu1 %2594, %v3438_v27   ;;  %v3441_v25 = vpop.permute.xlu1 %511  ;;  %v1178_v61 = vmul.f32 %v3342_v16, %v1088_v48 }
 0x1a0   :  { %v964_v24 = vpop.permute.xlu0 %963 }
 0x1a1   :  { %2595 = vset.pattern.permute.xlu1 %v4235_v2  ;;  %v3446_v23 = vpop.permute.xlu1 %639 }
 0x1a2   :  { %527 = vperm.xlu1 %2595, %v2856_v31  }
 0x1a5   :  { %v3449_v21 = vpop.permute.xlu1 %703 }
 0x1a6   :  { %655 = vperm.xlu1 %2595, %v3438_v27  }
 0x1aa   :  { %719 = vperm.xlu1 %2595, %v2865_v33   ;;  %v960_v9 = vpop.permute.xlu1 %959 }
 0x1ab   :  { %v1146_v26 = vmul.f32 %v3342_v16, %v960_v9  ;;  %v1242_v9 = vadd.f32 %v1178_v61, %v854_v49  ;;  %v775_v61 = vmul.f32 %v3331_v19, %v3446_v23 }
 0x1ad   :  { %v1210_v4 = vadd.f32 %v1146_v26, %v822_v54  ;;  %v743_v26 = vmul.f32 %v3331_v19, %v3441_v25  ;;  %v419_v54 = vmul.f32 %v3329_v47, %v3083_v7  ;;  %v1147_v25 = vmul.f32 %v3342_v16, %v964_v24  ;;  %v904_v24 = vpop.permute.xlu0 %903 }
 0x1ae   :  { %2596 = vset.pattern.permute.xlu1 %v4237_v51  ;;  %v1024_v30 = vpop.permute.xlu1 %1023 }
 0x1af   :  { %v1162_v60 = vmul.f32 %v3342_v16, %v1024_v30  ;;  %975 = vperm.xlu1 %2596, %v2843_v29   ;;  %v1258_v53 = vmax.f32 %v1194_v56, %v1210_v4  ;;  %v791_v4 = vmul.f32 %v3331_v19, %v3449_v21  ;;  %v451_v56 = vmul.f32 %v3329_v47, %v3432_v5 }
 0x1b0   :  { %v807_v7 = vadd.f32 %v743_v26, %v419_v54  ;;  %v761_v5 = vmul.f32 %v3331_v19, %v3281_v20  ;;  %v436_v26 = vmul.f32 %v3329_v47, %v3106_v58 }
 0x1b1   :  { %v1226_v22 = vadd.f32 %v1162_v60, %v838_v62  ;;  %v1096_v54 = vpop.permute.xlu0 %1095 }
 0x1b3   :  { %v1274_v59 = vmax.f32 %v1226_v22, %v1242_v9  ;;  %1039 = vperm.xlu1 %2596, %v3401_v15   ;;  %v139_v13 = vpop.permute.xlu1 %138 }
 0x1b4   :  { %v420_v48 = vmul.f32 %v3329_v47, %v139_v13 }
 0x1b5   :  { %v3474_v14 = vmax.f32 %v1258_v53, %v1274_v59 }
 0x1b6   :  { %v3476_v18 = vadd.f32 %v744_v6, %v420_v48  ;;  %v839_v6 = vadd.f32 %v775_v61, %v451_v56 }
 0x1b7   :  { %4308 = vst [vmem:[#allocation94_spill] sm:$0xff] %v3474_v14  ;;  %2597 = vset.pattern.permute.xlu1 %v4242_v43  ;;  %v299_v29 = vpop.permute.xlu1 %298 }
 0x1b8   :  { %158 = vperm.xlu1 %2597, %v3090_v32   ;;  %v452_v22 = vmul.f32 %v3329_v47, %v299_v29 }
 0x1bb   :  { %v379_v49 = vpop.permute.xlu1 %378 }
 0x1bc   :  { %v468_v30 = vmul.f32 %v3329_v47, %v379_v49  ;;  %318 = vperm.xlu1 %2597, %v3483_v50  }
 0x1be   :  { %v3489_v17 = vadd.f32 %v792_v11, %v468_v30 }
 0x1c0   :  { %398 = vperm.xlu1 %2597, %v3101_v0   ;;  %v580_v15 = vpop.permute.xlu1 %579  ;;  %v435_v0 = vmul.f32 %v3329_v47, %v3427_v44  ;;  %v467_v44 = vmul.f32 %v3329_v47, %v3095_v1 }
 0x1c2   :  { %v823_v60 = vadd.f32 %v759_v28, %v435_v0  ;;  %v855_v53 = vadd.f32 %v791_v4, %v467_v44  ;;  %v1180_v44 = vmul.f32 %v3342_v16, %v1096_v54 }
 0x1c4   :  { %2598 = vset.pattern.permute.xlu1 %v4235_v2  ;;  %v644_v32 = vpop.permute.xlu1 %643  ;;  %v1244_v56 = vadd.f32 %v1180_v44, %v3489_v17  ;;  %v421_v17 = vmul.f32 %v3329_v47, %v3117_v45 }
 0x1c5   :  { %v776_v62 = vmul.f32 %v3331_v19, %v644_v32  ;;  %595 = vperm.xlu1 %2598, %v2872_v34  }
 0x1c7   :  { %v3496_v40 = vadd.f32 %v776_v62, %v452_v22 }
 0x1c9   :  { %659 = vperm.xlu1 %2598, %v3483_v50   ;;  %v900_v57 = vpop.permute.xlu1 %899 }
 0x1ca   :  { %v1131_v37 = vmul.f32 %v3342_v16, %v900_v57 }
 0x1cc   :  { %v1195_v21 = vadd.f32 %v1131_v37, %v807_v7 }
 0x1cd   :  { %2599 = vset.pattern.permute.xlu1 %v4237_v51  ;;  %v1028_v12 = vpop.permute.xlu1 %1027 }
 0x1ce   :  { %915 = vperm.xlu1 %2599, %v2856_v31   ;;  %v1163_v9 = vmul.f32 %v3342_v16, %v1028_v12  ;;  %v1211_v31 = vadd.f32 %v1147_v25, %v823_v60  ;;  %v1132_v12 = vmul.f32 %v3342_v16, %v904_v24 }
 0x1d0   :  { %v1227_v13 = vadd.f32 %v1163_v9, %v839_v6  ;;  %v1259_v48 = vmax.f32 %v1195_v21, %v1211_v31  ;;  %v1196_v37 = vadd.f32 %v1132_v12, %v3476_v18  ;;  %v972_v21 = vpop.permute.xlu0 %971 }
 0x1d1   :  { %v1092_v23 = vpop.permute.xlu1 %1091 }
 0x1d2   :  { %v1179_v59 = vmul.f32 %v3342_v16, %v1092_v23  ;;  %1043 = vperm.xlu1 %2599, %v3438_v27   ;;  %v68_v27 = vld [vmem:[%s4194_s0 + $0x178] sm:$0xff] }
 0x1d4   :  { %v1243_v1 = vadd.f32 %v1179_v59, %v855_v53 }
 0x1d6   :  { %v1275_v29 = vmax.f32 %v1227_v13, %v1243_v1  ;;  %1107 = vperm.xlu1 %2599, %v2865_v33   ;;  %v224_v49 = vpop.permute.xlu1 %223 }
 0x1d7   :  { %v437_v11 = vmul.f32 %v3329_v47, %v224_v49  ;;  %v469_v49 = vmul.f32 %v3329_v47, %v3123_v42  ;;  %v912_v42 = vpop.permute.xlu0 %911 }
 0x1d8   :  { %v3526_v30 = vmax.f32 %v1259_v48, %v1275_v29 }
 0x1d9   :  { %v825_v32 = vadd.f32 %v761_v5, %v437_v11 }
 0x1da   :  { %4309 = vst [vmem:[#allocation95_spill] sm:$0xff] %v3526_v30  ;;  %2600 = vset.pattern.permute.xlu1 %v4242_v43  ;;  %v304_v22 = vpop.permute.xlu1 %303 }
 0x1db   :  { %243 = vperm.xlu1 %2600, %v3112_v55   ;;  %v453_v20 = vmul.f32 %v3329_v47, %v304_v22  ;;  %v760_v55 = vmul.f32 %v3331_v19, %v580_v15 }
 0x1dd   :  { %v824_v61 = vadd.f32 %v760_v55, %v436_v26 }
 0x1df   :  { %323 = vperm.xlu1 %2600, %v68_v27   ;;  %v520_v33 = vpop.permute.xlu1 %519 }
 0x1e3   :  { %2602 = vset.pattern.permute.xlu1 %v4235_v2  ;;  %v648_v62 = vpop.permute.xlu1 %647 }
 0x1e4   :  { %v777_v57 = vmul.f32 %v3331_v19, %v648_v62  ;;  %535 = vperm.xlu1 %2602, %v2879_v35  }
 0x1e6   :  { %v841_v28 = vadd.f32 %v777_v57, %v453_v20 }
 0x1e7   :  { %v712_v0 = vpop.permute.xlu1 %711 }
 0x1e8   :  { %663 = vperm.xlu1 %2602, %v68_v27   ;;  %v793_v48 = vmul.f32 %v3331_v19, %v712_v0 }
 0x1ea   :  { %v857_v22 = vadd.f32 %v793_v48, %v469_v49  ;;  %v4316_v48 = vld [vmem:[#allocation8_spill] sm:$0xff] }
 0x1ec   :  { %727 = vperm.xlu1 %2602, %v2885_v36   ;;  %v968_v2 = vpop.permute.xlu1 %967 }
 0x1ed   :  { %v1148_v4 = vmul.f32 %v3342_v16, %v968_v2  ;;  %v438_v2 = vmul.f32 %v3329_v47, %v3128_v52 }
 0x1ef   :  { %v1212_v25 = vadd.f32 %v1148_v4, %v824_v61  ;;  %v746_v4 = vmul.f32 %v3331_v19, %v3286_v10 }
 0x1f0   :  { %2604 = vset.pattern.permute.xlu1 %v4237_v51  ;;  %v1032_v15 = vpop.permute.xlu1 %1031 }
 0x1f1   :  { %v1260_v60 = vmax.f32 %v1196_v37, %v1212_v25  ;;  %v1164_v58 = vmul.f32 %v3342_v16, %v1032_v15  ;;  %983 = vperm.xlu1 %2604, %v2872_v34   ;;  %v745_v34 = vmul.f32 %v3331_v19, %v520_v33  ;;  %v794_v37 = vmul.f32 %v3331_v19, %v3297_v63 }
 0x1f2   :  { %v1134_v15 = vmul.f32 %v3342_v16, %v912_v42  ;;  %v4321_v42 = vld [vmem:[#allocation13_spill] sm:$0xff] }
 0x1f3   :  { %v1228_v36 = vadd.f32 %v1164_v58, %v3496_v40  ;;  %v1149_v40 = vmul.f32 %v3342_v16, %v972_v21 }
 0x1f5   :  { %v1276_v7 = vmax.f32 %v1228_v36, %v1244_v56  ;;  %1047 = vperm.xlu1 %2604, %v3483_v50   ;;  %v149_v9 = vpop.permute.xlu1 %148  ;;  %v809_v50 = vadd.f32 %v745_v34, %v421_v17  ;;  %v1213_v13 = vadd.f32 %v1149_v40, %v825_v32  ;;  %v4313_v17 = vld [vmem:[#allocation10_spill] sm:$0xff] }
 0x1f6   :  { %v422_v26 = vmul.f32 %v3329_v47, %v149_v9  ;;  %v735_v40 = vmul.f32 %v3331_v19, %v4313_v17 }
 0x1f7   :  { %v3551_v18 = vmax.f32 %v1260_v60, %v1276_v7 }
 0x1f8   :  { %v810_v58 = vadd.f32 %v746_v4, %v422_v26  ;;  %v430_v26 = vmul.f32 %v3329_v47, %v4321_v42 }
 0x1f9   :  { %4310 = vst [vmem:[#allocation96_spill] sm:$0xff] %v3551_v18  ;;  %923 = vperm.xlu1 %2604, %v2879_v35   ;;  %v309_v23 = vpop.permute.xlu1 %308 }
 0x1fa   :  { %v454_v56 = vmul.f32 %v3329_v47, %v309_v23  ;;  %v4314_v23 = vld [vmem:[#allocation5_spill] sm:$0xff] }
 0x1fd   :  { %1051 = vperm.xlu1 %2604, %v68_v27   ;;  %v389_v51 = vpop.permute.xlu1 %388 }
 0x1fe   :  { %v470_v12 = vmul.f32 %v3329_v47, %v389_v51 }
 0x200   :  { %v858_v36 = vadd.f32 %v794_v37, %v470_v12  ;;  %v4322_v12 = vld [vmem:[#allocation14_spill] sm:$0xff]  ;;  %v4325_v37 = vld [vmem:[#allocation16_spill] sm:$0xff] }
 0x202   :  { %v588_v6 = vpop.permute.xlu1 %587 }
 0x203   :  { %v762_v54 = vmul.f32 %v3331_v19, %v588_v6  ;;  %v1198_v6 = vadd.f32 %v1134_v15, %v810_v58 }
 0x205   :  { %v826_v52 = vadd.f32 %v762_v54, %v438_v2  ;;  %v4323_v54 = vld [vmem:[#allocation15_spill] sm:$0xff] }
 0x206   :  { %v652_v53 = vpop.permute.xlu1 %651  ;;  %v412_v2 = vmul.f32 %v3329_v47, %v4323_v54 }
 0x207   :  { %v778_v44 = vmul.f32 %v3331_v19, %v652_v53  ;;  %v4312_v53 = vld [vmem:[#allocation6_spill] sm:$0xff] }
 0x208   :  { %v411_v34 = vmul.f32 %v3329_v47, %v4312_v53  ;;  %v4333_v53 = vld [vmem:[#allocation31_spill] sm:$0xff] }
 0x209   :  { %v842_v9 = vadd.f32 %v778_v44, %v454_v56  ;;  %v3627_v44 = vmul.f32 %v3329_v47, %v4325_v37  ;;  %v751_v56 = vmul.f32 %v3331_v19, %v3174_v8  ;;  %v737_v8 = vmul.f32 %v3331_v19, %v4333_v53  ;;  %v4339_v37 = vld [vmem:[#allocation29_spill] sm:$0xff] }
 0x20b   :  { %v908_v59 = vpop.permute.xlu1 %907 }
 0x20c   :  { %v1133_v31 = vmul.f32 %v3342_v16, %v908_v59 }
 0x20e   :  { %v1197_v1 = vadd.f32 %v1133_v31, %v809_v50 }
 0x20f   :  { %v1036_v35 = vpop.permute.xlu1 %1035 }
 0x210   :  { %v1261_v29 = vmax.f32 %v1197_v1, %v1213_v13  ;;  %v1165_v5 = vmul.f32 %v3342_v16, %v1036_v35  ;;  %v427_v13 = vmul.f32 %v3329_v47, %v4314_v23  ;;  %v4315_v1 = vld [vmem:[#allocation7_spill] sm:$0xff] }
 0x211   :  { %v443_v35 = vmul.f32 %v3329_v47, %v4315_v1  ;;  %v4337_v1 = vld [vmem:[#allocation37_spill] sm:$0xff] }
 0x212   :  { %v1229_v27 = vadd.f32 %v1165_v5, %v841_v28  ;;  %v1104_v28 = vpop.permute.xlu0 %1103  ;;  %v3605_v5 = vadd.f32 %v735_v40, %v411_v34  ;;  %v4334_v34 = vld [vmem:[#allocation33_spill] sm:$0xff]  ;;  %v4335_v40 = vld [vmem:[#allocation35_spill] sm:$0xff] }
 0x213   :  { %v1100_v11 = vpop.permute.xlu1 %1099  ;;  %v1182_v60 = vmul.f32 %v3342_v16, %v1104_v28  ;;  %v3617_v28 = vmul.f32 %v3329_v47, %v4322_v12  ;;  %v769_v17 = vmul.f32 %v3331_v19, %v4334_v34 }
 0x214   :  { %v1181_v45 = vmul.f32 %v3342_v16, %v1100_v11  ;;  %v4318_v11 = vld [vmem:[#allocation9_spill] sm:$0xff] }
 0x215   :  { %v1246_v63 = vadd.f32 %v1182_v60, %v858_v36  ;;  %v4327_v60 = vld [vmem:[#allocation23_spill] sm:$0xff]  ;;  %v4328_v36 = vld [vmem:[#allocation17_spill] sm:$0xff] }
 0x216   :  { %v1245_v33 = vadd.f32 %v1181_v45, %v857_v22  ;;  %v428_v22 = vmul.f32 %v3329_v47, %v4318_v11  ;;  %v4319_v45 = vld [vmem:[#allocation11_spill] sm:$0xff]  ;;  %v768_v58 = vmul.f32 %v3331_v19, %v4327_v60  ;;  %v4338_v11 = vld [vmem:[#allocation38_spill] sm:$0xff]  ;;  %v815_v60 = vadd.f32 %v751_v56, %v427_v13  ;;  %v4344_v56 = vld [vmem:[#allocation53_spill] sm:$0xff] }
 0x218   :  { %v1277_v62 = vmax.f32 %v1229_v27, %v1245_v33  ;;  %v3564_v20 = vpop.permute.xlu1 %233  ;;  %v413_v27 = vmul.f32 %v3329_v47, %v4319_v45  ;;  %v4320_v33 = vld [vmem:[#allocation12_spill] sm:$0xff]  ;;  %v1156_v45 = vmul.f32 %v3342_v16, %v4338_v11  ;;  %v4345_v11 = vld [vmem:[#allocation39_spill] sm:$0xff] }
 0x21a   :  { %v3566_v32 = vmax.f32 %v1261_v29, %v1277_v62  ;;  %v459_v29 = vmul.f32 %v3329_v47, %v4316_v48  ;;  %v461_v62 = vmul.f32 %v3329_v47, %v4320_v33  ;;  %v1140_v48 = vmul.f32 %v3342_v16, %v4337_v1 }
 0x21c   :  { %4311 = vst [vmem:[#allocation97_spill] sm:$0xff] %v3566_v32  ;;  %v3568_v57 = vpop.permute.xlu1 %313  ;;  %v4375_v32 = vld [vmem:[#allocation70_spill] sm:$0xff] }
 0x221   :  { %v3570_v0 = vpop.permute.xlu1 %527 }
 0x225   :  { %v3572_v24 = vpop.permute.xlu1 %655 }
 0x229   :  { %v3574_v55 = vpop.permute.xlu1 %719 }
 0x22e   :  { %v976_v61 = vpop.permute.xlu1 %975 }
 0x22f   :  { %v1150_v25 = vmul.f32 %v3342_v16, %v976_v61  ;;  %v783_v61 = vmul.f32 %v3331_v19, %v3187_v39 }
 0x231   :  { %v1214_v51 = vadd.f32 %v1150_v25, %v826_v52  ;;  %v4326_v25 = vld [vmem:[#allocation21_spill] sm:$0xff]  ;;  %v444_v52 = vmul.f32 %v3329_v47, %v4328_v36  ;;  %v847_v33 = vadd.f32 %v783_v61, %v459_v29  ;;  %v4340_v36 = vld [vmem:[#allocation24_spill] sm:$0xff]  ;;  %v801_v61 = vadd.f32 %v737_v8, %v413_v27 }
 0x232   :  { %v1040_v7 = vpop.permute.xlu1 %1039  ;;  %v752_v15 = vmul.f32 %v3331_v19, %v4326_v25  ;;  %v445_v25 = vmul.f32 %v3329_v47, %v4339_v37  ;;  %v4347_v27 = vld [vmem:[#allocation44_spill] sm:$0xff] }
 0x233   :  { %v1166_v10 = vmul.f32 %v3342_v16, %v1040_v7  ;;  %v1262_v59 = vmax.f32 %v1198_v6, %v1214_v51  ;;  %v4329_v7 = vld [vmem:[#allocation18_spill] sm:$0xff]  ;;  %v832_v54 = vadd.f32 %v768_v58, %v444_v52 }
 0x234   :  { %v3639_v39 = vmul.f32 %v3329_v47, %v4329_v7  ;;  %v816_v12 = vadd.f32 %v752_v15, %v428_v22  ;;  %v1139_v7 = vmul.f32 %v3342_v16, %v4340_v36  ;;  %v833_v22 = vadd.f32 %v769_v17, %v445_v25  ;;  %v4351_v25 = vld [vmem:[#allocation41_spill] sm:$0xff]  ;;  %v4352_v36 = vld [vmem:[#allocation47_spill] sm:$0xff] }
 0x235   :  { %v1230_v21 = vadd.f32 %v1166_v10, %v842_v9  ;;  %v4330_v9 = vld [vmem:[#allocation19_spill] sm:$0xff]  ;;  %v4331_v10 = vld [vmem:[#allocation40_spill] sm:$0xff]  ;;  %v3677_v52 = vadd.f32 %v1156_v45, %v832_v54  ;;  %v4349_v45 = vld [vmem:[#allocation46_spill] sm:$0xff] }
 0x236   :  { %v460_v51 = vmul.f32 %v3329_v47, %v4330_v9  ;;  %v767_v6 = vmul.f32 %v3331_v19, %v4331_v10  ;;  %v4341_v9 = vld [vmem:[#allocation25_spill] sm:$0xff]  ;;  %v3675_v58 = vadd.f32 %v1140_v48, %v816_v12  ;;  %v3683_v1 = vadd.f32 %v1139_v7, %v815_v60  ;;  %v4350_v12 = vld [vmem:[#allocation51_spill] sm:$0xff] }
 0x237   :  { %v1278_v50 = vmax.f32 %v1230_v21, %v1246_v63  ;;  %v3595_v31 = vpop.permute.xlu1 %158  ;;  %v4332_v63 = vld [vmem:[#allocation20_spill] sm:$0xff]  ;;  %v1155_v10 = vmul.f32 %v3342_v16, %v4341_v9  ;;  %v1157_v54 = vmul.f32 %v3342_v16, %v4350_v12  ;;  %v446_v60 = vmul.f32 %v3329_v47, %v4351_v25 }
 0x238   :  { %v3647_v21 = vmul.f32 %v3329_v47, %v4332_v63  ;;  %v4342_v63 = vld [vmem:[#allocation26_spill] sm:$0xff]  ;;  %v831_v34 = vadd.f32 %v767_v6, %v443_v35  ;;  %v414_v35 = vmul.f32 %v3329_v47, %v4345_v11  ;;  %v4346_v6 = vld [vmem:[#allocation43_spill] sm:$0xff]  ;;  %v753_v7 = vmul.f32 %v3331_v19, %v4352_v36  ;;  %v4353_v9 = vld [vmem:[#allocation48_spill] sm:$0xff] }
 0x239   :  { %v3603_v49 = vmax.f32 %v1262_v59, %v1278_v50  ;;  %v785_v59 = vmul.f32 %v3331_v19, %v4335_v40  ;;  %v4336_v50 = vld [vmem:[#allocation22_spill] sm:$0xff]  ;;  %v1171_v53 = vmul.f32 %v3342_v16, %v4342_v63  ;;  %v4343_v40 = vld [vmem:[#allocation27_spill] sm:$0xff]  ;;  %v736_v37 = vmul.f32 %v3331_v19, %v4346_v6  ;;  %v4357_v12 = vld [vmem:[#allocation52_spill] sm:$0xff] }
 0x23a   :  { %v3657_v23 = vmul.f32 %v3329_v47, %v4336_v50  ;;  %v429_v29 = vmul.f32 %v3329_v47, %v4343_v40  ;;  %v1173_v50 = vmul.f32 %v3342_v16, %v4344_v56  ;;  %v3693_v17 = vadd.f32 %v1155_v10, %v831_v34  ;;  %v4354_v10 = vld [vmem:[#allocation49_spill] sm:$0xff]  ;;  %v4355_v40 = vld [vmem:[#allocation42_spill] sm:$0xff]  ;;  %v4358_v36 = vld [vmem:[#allocation55_spill] sm:$0xff] }
 0x23b   :  { %4317 = vst [vmem:[#allocation6_spill] sm:$0xff] %v3603_v49  ;;  %v3623_v4 = vpop.permute.xlu1 %318  ;;  %v849_v15 = vadd.f32 %v785_v59, %v461_v62  ;;  %v3679_v13 = vadd.f32 %v1171_v53, %v847_v33  ;;  %v754_v62 = vmul.f32 %v3331_v19, %v4347_v27  ;;  %v4348_v59 = vld [vmem:[#allocation45_spill] sm:$0xff]  ;;  %v770_v33 = vmul.f32 %v3331_v19, %v4349_v45  ;;  %v4356_v11 = vld [vmem:[#allocation50_spill] sm:$0xff] }
 0x23c   :  { %4324 = vst [vmem:[#allocation10_spill] sm:$0xff] %v3623_v4  ;;  %v784_v48 = vmul.f32 %v3331_v19, %v4348_v59  ;;  %v738_v63 = vmul.f32 %v3331_v19, %v4353_v9  ;;  %v1125_v53 = vmul.f32 %v3342_v16, %v4354_v10  ;;  %v462_v56 = vmul.f32 %v3329_v47, %v4355_v40  ;;  %v4360_v40 = vld [vmem:[#allocation76_spill] sm:$0xff] }
 0x23d   :  { %v1267_v34 = vmax.f32 %v3693_v17, %v3679_v13  ;;  %v786_v6 = vmul.f32 %v3331_v19, %v4356_v11  ;;  %v3715_v27 = vadd.f32 %v1173_v50, %v849_v15  ;;  %v800_v59 = vadd.f32 %v736_v37, %v412_v2 }
 0x23e   :  { %v818_v45 = vadd.f32 %v754_v62, %v430_v26  ;;  %v755_v25 = vmul.f32 %v3331_v19, %v4357_v12  ;;  %v431_v9 = vmul.f32 %v3329_v47, %v4358_v36  ;;  %v848_v43 = vadd.f32 %v784_v48, %v460_v51  ;;  %v4361_v26 = vld [vmem:[#allocation59_spill] sm:$0xff]  ;;  %v4362_v12 = vld [vmem:[#allocation54_spill] sm:$0xff]  ;;  %v4363_v48 = vld [vmem:[#allocation61_spill] sm:$0xff] }
 0x23f   :  { %v3663_v42 = vpop.permute.xlu1 %398  ;;  %v834_v13 = vadd.f32 %v770_v33, %v446_v60  ;;  %v3723_v17 = vadd.f32 %v1157_v54, %v833_v22  ;;  %v1123_v49 = vmul.f32 %v3342_v16, %v4360_v40  ;;  %v817_v11 = vadd.f32 %v753_v7, %v429_v29  ;;  %v4364_v54 = vld [vmem:[#allocation56_spill] sm:$0xff]  ;;  %v4369_v40 = vld [vmem:[#allocation77_spill] sm:$0xff] }
 0x240   :  { %v802_v15 = vadd.f32 %v738_v63, %v414_v35  ;;  %v3727_v50 = vadd.f32 %v1125_v53, %v801_v61  ;;  %v739_v2 = vmul.f32 %v3331_v19, %v4361_v26  ;;  %v850_v37 = vadd.f32 %v786_v6, %v462_v56  ;;  %v4365_v35 = vld [vmem:[#allocation57_spill] sm:$0xff]  ;;  %v4366_v60 = vld [vmem:[#allocation60_spill] sm:$0xff]  ;;  %v4367_v63 = vld [vmem:[#allocation58_spill] sm:$0xff] }
 0x241   :  { %v740_v51 = vmul.f32 %v3331_v19, %v4362_v12  ;;  %v787_v22 = vmul.f32 %v3331_v19, %v4363_v48  ;;  %v819_v33 = vadd.f32 %v755_v25, %v431_v9  ;;  %v788_v29 = vmul.f32 %v3331_v19, %v4364_v54  ;;  %v4368_v56 = vld [vmem:[#allocation62_spill] sm:$0xff]  ;;  %v4370_v12 = vld [vmem:[#allocation63_spill] sm:$0xff]  ;;  %v4371_v54 = vld [vmem:[#allocation64_spill] sm:$0xff] }
 0x242   :  { %v447_v61 = vmul.f32 %v3329_v47, %v4365_v35  ;;  %v771_v7 = vmul.f32 %v3331_v19, %v4366_v60  ;;  %v3745_v53 = vmul.f32 %v3331_v19, %v4367_v63  ;;  %v1142_v6 = vmul.f32 %v3342_v16, %v4368_v56  ;;  %v4372_v56 = vld [vmem:[#allocation66_spill] sm:$0xff]  ;;  %v4374_v62 = vld [vmem:[#allocation68_spill] sm:$0xff] }
 0x243   :  { %v1187_v36 = vadd.f32 %v1123_v49, %v3605_v5  ;;  %v1175_v25 = vmul.f32 %v3342_v16, %v4369_v40  ;;  %v803_v26 = vadd.f32 %v739_v2, %v3617_v28  ;;  %v1158_v48 = vmul.f32 %v3342_v16, %v4370_v12  ;;  %v4373_v5 = vld [vmem:[#allocation75_spill] sm:$0xff] }
 0x244   :  { %v3691_v8 = vpop.permute.xlu1 %595  ;;  %v416_v35 = vmul.f32 %v3329_v47, %v4371_v54  ;;  %v1172_v60 = vmul.f32 %v3342_v16, %v3394_v41  ;;  %v851_v63 = vadd.f32 %v787_v22, %v3627_v44  ;;  %v464_v49 = vmul.f32 %v3329_v47, %v4372_v56  ;;  %v4376_v22 = vld [vmem:[#allocation72_spill] sm:$0xff] }
 0x245   :  { %v1159_v40 = vmul.f32 %v3342_v16, %v4373_v5  ;;  %v1124_v28 = vmul.f32 %v3342_v16, %v3391_v3  ;;  %v835_v2 = vadd.f32 %v771_v7, %v447_v61  ;;  %v756_v12 = vmul.f32 %v3331_v19, %v4374_v62  ;;  %v4377_v7 = vld [vmem:[#allocation65_spill] sm:$0xff] }
 0x246   :  { %v772_v54 = vmul.f32 %v3331_v19, %v4375_v32  ;;  %v1141_v41 = vmul.f32 %v3342_v16, %v3403_v46  ;;  %v1206_v44 = vadd.f32 %v1142_v6, %v818_v45  ;;  %v1127_v56 = vmul.f32 %v3342_v16, %v4376_v22  ;;  %v4386_v22 = vld [vmem:[#allocation85_spill] sm:$0xff] }
 0x247   :  { %v1251_v18 = vmax.f32 %v1187_v36, %v3683_v1  ;;  %v3777_v5 = vadd.f32 %v1175_v25, %v851_v63  ;;  %v1222_v3 = vadd.f32 %v1158_v48, %v834_v13  ;;  %v804_v61 = vadd.f32 %v740_v51, %v416_v35  ;;  %v4378_v36 = vld [vmem:[#allocation86_spill] sm:$0xff]  ;;  %v4379_v48 = vld [vmem:[#allocation89_spill] sm:$0xff] }
 0x248   :  { %v3721_v10 = vpop.permute.xlu1 %659  ;;  %v448_v62 = vmul.f32 %v3329_v47, %v4377_v7  ;;  %v1236_v4 = vadd.f32 %v1172_v60, %v848_v43  ;;  %v852_v32 = vadd.f32 %v788_v29, %v464_v49  ;;  %v1188_v14 = vadd.f32 %v1124_v28, %v800_v59  ;;  %v4380_v59 = vld [vmem:[#allocation78_spill] sm:$0xff]  ;;  %v4381_v35 = vld [vmem:[#allocation81_spill] sm:$0xff]  ;;  %v4382_v60 = vld [vmem:[#allocation83_spill] sm:$0xff] }
 0x249   :  { %4359 = vst [vmem:[#allocation5_spill] sm:$0xff] %v3721_v10  ;;  %v1223_v10 = vadd.f32 %v1159_v40, %v835_v2  ;;  %v1174_v46 = vmul.f32 %v3342_v16, %v3411_v38  ;;  %v820_v45 = vadd.f32 %v756_v12, %v3639_v39  ;;  %v1205_v1 = vadd.f32 %v1141_v41, %v817_v11  ;;  %v4384_v40 = vld [vmem:[#allocation92_spill] sm:$0xff]  ;;  %v4385_v2 = vld [vmem:[#allocation82_spill] sm:$0xff]  ;;  %v4388_v7 = vld [vmem:[#allocation91_spill] sm:$0xff] }
 0x24a   :  { %v836_v6 = vadd.f32 %v772_v54, %v448_v62  ;;  %v1126_v25 = vmul.f32 %v3342_v16, %v4378_v36  ;;  %v1191_v63 = vadd.f32 %v1127_v56, %v803_v26  ;;  %v3788_v13 = vmax.f32 %v1251_v18, %v1267_v34  ;;  %v4383_v18 = vld [vmem:[#allocation79_spill] sm:$0xff] }
 0x24b   :  { %v1271_v51 = vmax.f32 %v1223_v10, %v3777_v5  ;;  %v1143_v43 = vmul.f32 %v3342_v16, %v4379_v48  ;;  %v433_v38 = vmul.f32 %v3329_v47, %v4380_v59  ;;  %v741_v39 = vmul.f32 %v3331_v19, %v4381_v35  ;;  %v4392_v59 = vld [vmem:[#allocation88_spill] sm:$0xff] }
 0x24c   :  { %v1268_v11 = vmax.f32 %v3677_v52, %v1236_v4  ;;  %v789_v26 = vmul.f32 %v3331_v19, %v4382_v60  ;;  %v449_v34 = vmul.f32 %v3329_v47, %v4383_v18  ;;  %v1252_v10 = vmax.f32 %v1188_v14, %v3675_v58  ;;  %v4387_v52 = vld [vmem:[#allocation80_spill] sm:$0xff]  ;;  %v4389_v58 = vld [vmem:[#allocation90_spill] sm:$0xff] }
 0x24d   :  { %v3752_v9 = vpop.permute.xlu1 %915  ;;  %v1238_v49 = vadd.f32 %v1174_v46, %v850_v37  ;;  %v1176_v28 = vmul.f32 %v3342_v16, %v4384_v40  ;;  %v773_v12 = vmul.f32 %v3331_v19, %v4385_v2  ;;  %v1253_v54 = vmax.f32 %v3727_v50, %v1205_v1 }
 0x24e   :  { %v1190_v41 = vadd.f32 %v1126_v25, %v802_v15  ;;  %v1160_v4 = vmul.f32 %v3342_v16, %v4386_v22  ;;  %v1320_v56 = vmul.f32 %v4387_v52, %v4387_v52  ;;  %v1207_v5 = vadd.f32 %v1143_v43, %v819_v33  ;;  %v4390_v15 = vld [vmem:[#allocation84_spill] sm:$0xff]  ;;  %v4391_v33 = vld [vmem:[#allocation87_spill] sm:$0xff]  ;;  %v980_v22 = vpop.permute.xlu0 %979 }
 0x24f   :  { %v1128_v14 = vmul.f32 %v3342_v16, %v4388_v7  ;;  %v1177_v37 = vmul.f32 %v3342_v16, %v4389_v58  ;;  %v805_v62 = vadd.f32 %v741_v39, %v3647_v21  ;;  %v3819_v46 = vmax.f32 %v1252_v10, %v1268_v11  ;;  %v4394_v10 = vld [vmem:[#allocation93_spill] sm:$0xff] }
 0x250   :  { %v853_v50 = vadd.f32 %v789_v26, %v3657_v23  ;;  %v1144_v1 = vmul.f32 %v3342_v16, %v4390_v15  ;;  %v1270_v25 = vmax.f32 %v1222_v3, %v1238_v49  ;;  %v1240_v48 = vadd.f32 %v1176_v28, %v852_v32 }
 0x251   :  { %v3779_v30 = vpop.permute.xlu1 %1043  ;;  %v1129_v43 = vmul.f32 %v3342_v16, %v4391_v33  ;;  %v1161_v35 = vmul.f32 %v3342_v16, %v4392_v59  ;;  %v837_v60 = vadd.f32 %v773_v12, %v449_v34  ;;  %v4393_v21 = vmax.f32 %v3723_v17, %v3715_v27  ;;  %v4395_v59 = vld [vmem:[#allocation28_spill] sm:$0xff] }
 0x252   :  { %v1254_v23 = vmax.f32 %v1190_v41, %v1206_v44  ;;  %v1224_v11 = vadd.f32 %v1160_v4, %v836_v6  ;;  %v1255_v26 = vmax.f32 %v1191_v63, %v1207_v5  ;;  %v1192_v18 = vadd.f32 %v1128_v14, %v804_v61 }
 0x253   :  { %v3833_v39 = vmax.f32 %v1253_v54, %v4393_v21  ;;  %v1145_v3 = vmul.f32 %v3342_v16, %v4394_v10  ;;  %v1241_v32 = vadd.f32 %v1177_v37, %v853_v50  ;;  %v1321_v49 = vmul.f32 %v3788_v13, %v3788_v13  ;;  %v4399_v10 = vld [vmem:[#allocation36_spill] sm:$0xff] }
 0x254   :  { %v821_v40 = vadd.f32 %v3745_v53, %v433_v38  ;;  %v1322_v34 = vmul.f32 %v3819_v46, %v3819_v46  ;;  %v1208_v28 = vadd.f32 %v1144_v1, %v820_v45  ;;  %v3844_v17 = vmax.f32 %v1254_v23, %v1270_v25  ;;  %v920_v25 = vpop.permute.xlu0 %919  ;;  %v4397_v23 = vld [vmem:[#allocation32_spill] sm:$0xff] }
 0x255   :  { %v3793_v29 = vpop.permute.xlu1 %1107  ;;  %v1272_v44 = vmax.f32 %v1224_v11, %v1240_v48  ;;  %v1193_v6 = vadd.f32 %v1129_v43, %v805_v62  ;;  %v1225_v61 = vadd.f32 %v1161_v35, %v837_v60  ;;  %v1299_v63 = vadd.f32 %v3788_v13, %v4387_v52  ;;  %v4396_v60 = vld [vmem:[#allocation30_spill] sm:$0xff] }
 0x256   :  { %v1336_v2 = vadd.f32 %v1321_v49, %v1320_v56  ;;  %v1323_v12 = vmul.f32 %v3833_v39, %v3833_v39  ;;  %v3850_v54 = vmax.f32 %v1255_v26, %v1271_v51  ;;  %v1256_v53 = vmax.f32 %v1192_v18, %v1208_v28  ;;  %v4398_v26 = vld [vmem:[#allocation34_spill] sm:$0xff] }
 0x257   :  { %v1209_v38 = vadd.f32 %v1145_v3, %v821_v40  ;;  %v1273_v41 = vmax.f32 %v1225_v61, %v1241_v32  ;;  %v1300_v45 = vadd.f32 %v1299_v63, %v3819_v46  ;;  %v1324_v5 = vmul.f32 %v3844_v17, %v3844_v17  ;;  %v4402_v61 = vld [vmem:[#allocation71_spill] sm:$0xff] }
 0x258   :  { %v1337_v4 = vadd.f32 %v1336_v2, %v1322_v34  ;;  %v3855_v7 = vmax.f32 %v1256_v53, %v1272_v44  ;;  %v1325_v51 = vmul.f32 %v3850_v54, %v3850_v54  ;;  %v423_v35 = vmul.f32 %v3329_v47, %v4395_v59  ;;  %v4400_v34 = vld [vmem:[#allocation67_spill] sm:$0xff]  ;;  %v4401_v44 = vld [vmem:[#allocation69_spill] sm:$0xff] }
 0x259   :  { %v1257_v14 = vmax.f32 %v1193_v6, %v1209_v38  ;;  %v1301_v56 = vadd.f32 %v1300_v45, %v3833_v39  ;;  %v471_v21 = vmul.f32 %v3329_v47, %v4396_v60  ;;  %v440_v11 = vmul.f32 %v3329_v47, %v4397_v23 }
 0x25a   :  { %v3824_v36 = vpop.permute.xlu1 %243  ;;  %v1338_v58 = vadd.f32 %v1337_v4, %v1323_v12  ;;  %v1326_v15 = vmul.f32 %v3855_v7, %v3855_v7  ;;  %v3880_v18 = vmul.f32 %v3329_v47, %v4398_v26  ;;  %v3884_v3 = vmul.f32 %v3329_v47, %v4399_v10  ;;  %v4403_v12 = vld [vmem:[#allocation74_spill] sm:$0xff]  ;;  %v1112_v4 = vpop.permute.xlu0 %1111  ;;  %v4407_v10 = vld [vmem:[#allocation95_spill] sm:$0xff] }
 0x25b   :  { %v3862_v37 = vmax.f32 %v1257_v14, %v1273_v41  ;;  %v1302_v62 = vadd.f32 %v1301_v56, %v3844_v17  ;;  %v763_v28 = vmul.f32 %v3331_v19, %v4400_v34  ;;  %v748_v6 = vmul.f32 %v3331_v19, %v4401_v44 }
 0x25c   :  { %v1339_v50 = vadd.f32 %v1338_v58, %v1324_v5  ;;  %v796_v63 = vmul.f32 %v3331_v19, %v4402_v61  ;;  %v795_v2 = vmul.f32 %v3331_v19, %v3574_v55  ;;  %v765_v53 = vmul.f32 %v3331_v19, %v4403_v12 }
 0x25d   :  { %v1303_v48 = vadd.f32 %v1302_v62, %v3850_v54  ;;  %v1327_v43 = vmul.f32 %v3862_v37, %v3862_v37  ;;  %v439_v45 = vmul.f32 %v3329_v47, %v3564_v20  ;;  %v747_v5 = vmul.f32 %v3331_v19, %v3570_v0 }
 0x25e   :  { %v3842_v27 = vpop.permute.xlu1 %323  ;;  %v1340_v33 = vadd.f32 %v1339_v50, %v1325_v51  ;;  %v779_v14 = vmul.f32 %v3331_v19, %v3572_v24  ;;  %v424_v56 = vmul.f32 %v3329_v47, %v3595_v31  ;;  %v1183_v55 = vmul.f32 %v3342_v16, %v3793_v29 }
 0x25f   :  { %v1304_v32 = vadd.f32 %v1303_v48, %v3855_v7  ;;  %v1151_v58 = vmul.f32 %v3342_v16, %v980_v22  ;;  %v1136_v51 = vmul.f32 %v3342_v16, %v920_v25  ;;  %v472_v20 = vmul.f32 %v3329_v47, %v3663_v42  ;;  %v4404_v22 = vld [vmem:[#allocation94_spill] sm:$0xff]  ;;  %v4405_v48 = vld [vmem:[#allocation5_spill] sm:$0xff] }
 0x260   :  { %v1341_v49 = vadd.f32 %v1340_v33, %v1326_v15  ;;  %v764_v62 = vmul.f32 %v3331_v19, %v3691_v8  ;;  %v455_v0 = vmul.f32 %v3329_v47, %v3568_v57  ;;  %v859_v24 = vadd.f32 %v795_v2, %v471_v21 }
 0x261   :  { %v1305_v38 = vadd.f32 %v1304_v32, %v3862_v37  ;;  %v1135_v31 = vmul.f32 %v3342_v16, %v3752_v9  ;;  %v1167_v29 = vmul.f32 %v3342_v16, %v3779_v30  ;;  %v1328_v15 = vmul.f32 %v4404_v22, %v4404_v22  ;;  %v4406_v9 = vld [vmem:[#allocation10_spill] sm:$0xff] }
 0x262   :  { %v1342_v41 = vadd.f32 %v1341_v49, %v1327_v43  ;;  %v827_v25 = vadd.f32 %v763_v28, %v439_v45  ;;  %v780_v42 = vmul.f32 %v3331_v19, %v4405_v48  ;;  %v811_v33 = vadd.f32 %v747_v5, %v423_v35  ;;  %v988_v49 = vpop.permute.xlu0 %987 }
 0x263   :  { %v3857_v52 = vpop.permute.xlu1 %535  ;;  %v843_v43 = vadd.f32 %v779_v14, %v455_v0  ;;  %v812_v57 = vadd.f32 %v748_v6, %v424_v56  ;;  %v1247_v59 = vadd.f32 %v1183_v55, %v859_v24  ;;  %v1184_v60 = vmul.f32 %v3342_v16, %v1112_v4  ;;  %v4408_v55 = vld [vmem:[#allocation96_spill] sm:$0xff] }
 0x264   :  { %v456_v21 = vmul.f32 %v3329_v47, %v4406_v9  ;;  %v860_v30 = vadd.f32 %v796_v63, %v472_v20  ;;  %v828_v23 = vadd.f32 %v764_v62, %v440_v11  ;;  %v1306_v26 = vadd.f32 %v1305_v38, %v4404_v22 }
 0x265   :  { %v1329_v32 = vmul.f32 %v4407_v10, %v4407_v10  ;;  %v1199_v34 = vadd.f32 %v1135_v31, %v811_v33  ;;  %v1231_v28 = vadd.f32 %v1167_v29, %v843_v43  ;;  %v1343_v35 = vadd.f32 %v1342_v41, %v1328_v15  ;;  %v4409_v31 = vld [vmem:[#allocation97_spill] sm:$0xff]  ;;  %v4410_v43 = vld [vmem:[#allocation6_spill] sm:$0xff] }
 0x266   :  { %v844_v61 = vadd.f32 %v780_v42, %v456_v21  ;;  %v1215_v12 = vadd.f32 %v1151_v58, %v827_v25  ;;  %v1200_v45 = vadd.f32 %v1136_v51, %v812_v57  ;;  %v441_v11 = vmul.f32 %v3329_v47, %v3824_v36  ;;  %v1116_v29 = vpop.permute.xlu0 %1115 }
 0x267   :  { %v3867_v1 = vpop.permute.xlu1 %663  ;;  %v1279_v4 = vmax.f32 %v1231_v28, %v1247_v59  ;;  %v1248_v63 = vadd.f32 %v1184_v60, %v860_v30  ;;  %v749_v38 = vmul.f32 %v3331_v19, %v3857_v52  ;;  %v1307_v56 = vadd.f32 %v1306_v26, %v4407_v10 }
 0x268   :  { %v1344_v41 = vadd.f32 %v1343_v35, %v1329_v32  ;;  %v1330_v20 = vmul.f32 %v4408_v55, %v4408_v55  ;;  %v1263_v62 = vmax.f32 %v1199_v34, %v1215_v12  ;;  %v781_v51 = vmul.f32 %v3331_v19, %v3867_v1 }
 0x269   :  { %v1308_v52 = vadd.f32 %v1307_v56, %v4408_v55  ;;  %v829_v15 = vadd.f32 %v765_v53, %v441_v11  ;;  %v457_v25 = vmul.f32 %v3329_v47, %v3842_v27  ;;  %v813_v48 = vadd.f32 %v749_v38, %v3880_v18 }
 0x26a   :  { %v1345_v42 = vadd.f32 %v1344_v41, %v1330_v20  ;;  %v1153_v33 = vmul.f32 %v3342_v16, %v988_v49  ;;  %v1332_v57 = vmul.f32 %v4410_v43, %v4410_v43  ;;  %v1185_v53 = vmul.f32 %v3342_v16, %v1116_v29  ;;  %v1298_v29 = vld [vmem:[%s4197_s3] sm:$0x1] }
 0x26b   :  { %v728_v40 = vpop.permute.xlu1 %727  ;;  %v845_v60 = vadd.f32 %v781_v51, %v457_v25 }
 0x26c   :  { %v797_v5 = vmul.f32 %v3331_v19, %v728_v40  ;;  %v1331_v40 = vmul.f32 %v4409_v31, %v4409_v31  ;;  %v1217_v21 = vadd.f32 %v1153_v33, %v829_v15 }
 0x26e   :  { %v861_v19 = vadd.f32 %v797_v5, %v3884_v3  ;;  %v1346_v27 = vadd.f32 %v1345_v42, %v1331_v40 }
 0x270   :  { %v984_v50 = vpop.permute.xlu1 %983  ;;  %v1249_v30 = vadd.f32 %v1185_v53, %v861_v19  ;;  %v1347_v26 = vadd.f32 %v1346_v27, %v1332_v57 }
 0x271   :  { %v1152_v8 = vmul.f32 %v3342_v16, %v984_v50  ;;  %v3946_v50 = vmax.f32 %v1263_v62, %v1279_v4 }
 0x273   :  { %v1216_v6 = vadd.f32 %v1152_v8, %v828_v23  ;;  %v1309_v8 = vadd.f32 %v1308_v52, %v4409_v31  ;;  %v1333_v3 = vmul.f32 %v3946_v50, %v3946_v50 }
 0x274   :  { %v1048_v44 = vpop.permute.xlu1 %1047 }
 0x275   :  { %v1168_v2 = vmul.f32 %v3342_v16, %v1048_v44  ;;  %v1264_v0 = vmax.f32 %v1200_v45, %v1216_v6  ;;  %v1310_v18 = vadd.f32 %v1309_v8, %v4410_v43  ;;  %v1348_v44 = vadd.f32 %v1347_v26, %v1333_v3 }
 0x277   :  { %v1232_v14 = vadd.f32 %v1168_v2, %v844_v61  ;;  %v1311_v32 = vadd.f32 %v1310_v18, %v3946_v50 }
 0x278   :  { %v924_v58 = vpop.permute.xlu1 %923 }
 0x279   :  { %v1280_v36 = vmax.f32 %v1232_v14, %v1248_v63  ;;  %v1137_v24 = vmul.f32 %v3342_v16, %v924_v58 }
 0x27b   :  { %v3952_v1 = vmax.f32 %v1264_v0, %v1280_v36  ;;  %v1201_v9 = vadd.f32 %v1137_v24, %v813_v48  ;;  %v4411_v48 = vmov 0  }
 0x27c   :  { %v1052_v59 = vpop.permute.xlu1 %1051 }
 0x27d   :  { %v1169_v47 = vmul.f32 %v3342_v16, %v1052_v59  ;;  %v1334_v49 = vmul.f32 %v3952_v1, %v3952_v1  ;;  %v1265_v34 = vmax.f32 %v1201_v9, %v1217_v21  ;;  %v1312_v16 = vadd.f32 %v1311_v32, %v3952_v1  ;;  %v1365_v32 = vld [vmem:[%s4196_s2] sm:$0xff] }
 0x27f   :  { %v1233_v23 = vadd.f32 %v1169_v47, %v845_v60  ;;  %v1349_v61 = vadd.f32 %v1348_v44, %v1334_v49  ;;  %v1366_v49 = vld [vmem:[%s4196_s2 + $0x8] sm:$0xff] }
 0x281   :  { %v1281_v28 = vmax.f32 %v1233_v23, %v1249_v30 }
 0x283   :  { %v3967_v35 = vmax.f32 %v1265_v34, %v1281_v28 }
 0x285   :  { %v1313_v6 = vadd.f32 %v1312_v16, %v3967_v35  ;;  %v1335_v2 = vmul.f32 %v3967_v35, %v3967_v35 }
 0x287   :  { %v1314_v12 = vrot.slane %v1313_v6, 4  ;;  %v1350_v45 = vadd.f32 %v1349_v61, %v1335_v2  ;;  %v1368_v2 = vld [vmem:[%s4196_s2 + $0x18] sm:$0xff] }
 0x289   :  { %v1315_v4 = vadd.f32 %v1314_v12, %v1313_v6  ;;  %v1351_v11 = vrot.slane %v1350_v45, 4  ;;  %v1367_v6 = vld [vmem:[%s4196_s2 + $0x10] sm:$0xff] }
 0x28b   :  { %v1316_v63 = vrot.slane %v1315_v4, 2  ;;  %v1352_v38 = vadd.f32 %v1351_v11, %v1350_v45 }
 0x28d   :  { %v1317_v5 = vadd.f32 %v1316_v63, %v1315_v4  ;;  %v1353_v14 = vrot.slane %v1352_v38, 2 }
 0x28f   :  { %v1318_v56 = vrot.slane %v1317_v5, 1  ;;  %v1354_v41 = vadd.f32 %v1353_v14, %v1352_v38  ;;  %v1369_v38 = vld [vmem:[%s4196_s2 + $0x20] sm:$0xff] }
 0x291   :  { %v1319_v20 = vadd.f32 %v1318_v56, %v1317_v5  ;;  %v1355_v62 = vrot.slane %v1354_v41, 1  ;;  %v1370_v5 = vld [vmem:[%s4196_s2 + $0x28] sm:$0xff] }
 0x293   :  { %v1356_v58 = vadd.f32 %v1355_v62, %v1354_v41  ;;  %v1357_v51 = vmul.f32 0.0078125, %v1319_v20 }
 0x295   :  { %v1358_v0 = vmul.f32 0.0078125, %v1356_v58  ;;  %v1359_v36 = vmul.f32 %v1357_v51, %v1357_v51  ;;  %v1371_v58 = vld [vmem:[%s4196_s2 + $0x30] sm:$0xff]  ;;  %v1372_v51 = vld [vmem:[%s4196_s2 + $0x38] sm:$0xff] }
 0x297   :  { %v1360_v24 = vsub.f32 %v1358_v0, %v1359_v36 }
 0x299   :  { %v1361_v52 = vmax.f32 %v1360_v24, 0.0 }
 0x29b   :  { %v1362_v40 = vadd.f32 1e-05, %v1361_v52 }
 0x29d   :  { %2607 = vrsqrt.f32 %v1362_v40  ;;  %v1373_v40 = vld [vmem:[%s4196_s2 + $0x40] sm:$0xff] }
 0x2a7   :  { %v2608_v15 = vpop.eup %2607 }
 0x2a8   :  { %v1364_v25 = vmul.f32 %v2608_v15, %v1298_v29  ;;  %v1374_v15 = vld [vmem:[%s4196_s2 + $0x48] sm:$0xff] }
 0x2aa   :  { %1381 = vxpose.xlu1.b32.start.end [1/1] (short) %v1364_v25, 128 }
 0x2c8   :  { %2606 = vset.pattern.permute.xlu1 %v4411_v48 }
 0x32a   :  { %v1397_v19 = vpop.trf.xlu1 }
 0x32b   :  { %1415 = vperm.xlu0 %2605, %v1397_v19  }
 0x32e   :  { %v1398_v42 = vpop.trf.xlu1 }
 0x32f   :  { %1420 = vperm.xlu0 %2605, %v1398_v42  }
 0x332   :  { %v1399_v8 = vpop.trf.xlu1 }
 0x333   :  { %1425 = vperm.xlu0 %2605, %v1399_v8  }
 0x336   :  { %v1400_v33 = vpop.trf.xlu1 }
 0x337   :  { %1430 = vperm.xlu0 %2605, %v1400_v33   ;;  %v1375_v33 = vld [vmem:[%s4196_s2 + $0x50] sm:$0xff] }
 0x33a   :  { %v1401_v57 = vpop.trf.xlu1 }
 0x33b   :  { %1435 = vperm.xlu0 %2605, %v1401_v57   ;;  %v1376_v57 = vld [vmem:[%s4196_s2 + $0x58] sm:$0xff] }
 0x33e   :  { %v1402_v59 = vpop.trf.xlu1 }
 0x33f   :  { %1440 = vperm.xlu0 %2605, %v1402_v59  }
 0x342   :  { %v1403_v53 = vpop.trf.xlu1 }
 0x343   :  { %1445 = vperm.xlu0 %2605, %v1403_v53  }
 0x346   :  { %v1404_v60 = vpop.trf.xlu1 }
 0x347   :  { %1450 = vperm.xlu0 %2605, %v1404_v60  }
 0x34a   :  { %v1405_v9 = vpop.trf.xlu1 }
 0x34b   :  { %1455 = vperm.xlu0 %2605, %v1405_v9  }
 0x34e   :  { %v1406_v47 = vpop.trf.xlu1 }
 0x34f   :  { %1460 = vperm.xlu1 %2606, %v1406_v47  }
 0x352   :  { %v1407_v27 = vpop.trf.xlu1 }
 0x353   :  { %1465 = vperm.xlu0 %2605, %v1407_v27   ;;  %v1377_v27 = vld [vmem:[%s4196_s2 + $0x60] sm:$0xff] }
 0x356   :  { %v1408_v18 = vpop.trf.xlu1 }
 0x357   :  { %1470 = vperm.xlu0 %2605, %v1408_v18   ;;  %v1378_v18 = vld [vmem:[%s4196_s2 + $0x68] sm:$0xff] }
 0x35a   :  { %v1409_v3 = vpop.trf.xlu1 }
 0x35b   :  { %1475 = vperm.xlu0 %2605, %v1409_v3  }
 0x35e   :  { %v1410_v21 = vpop.trf.xlu1 }
 0x35f   :  { %1480 = vperm.xlu0 %2605, %v1410_v21  }
 0x362   :  { %v1411_v30 = vpop.trf.xlu1 }
 0x363   :  { %1485 = vperm.xlu0 %2605, %v1411_v30  }
 0x366   :  { %v1412_v23 = vpop.trf.xlu1 }
 0x367   :  { %1490 = vperm.xlu0 %2605, %v1412_v23  }
 0x3aa   :  { %v1416_v26 = vpop.permute.xlu0 %1415 }
 0x3ab   :  { %v1493_v28 = vmul.f32 %v1416_v26, %v1365_v32  ;;  %v1379_v32 = vld [vmem:[%s4196_s2 + $0x70] sm:$0xff] }
 0x3ae   :  { %v1421_v34 = vpop.permute.xlu0 %1420 }
 0x3af   :  { %v1494_v44 = vmul.f32 %v1421_v34, %v1366_v49  ;;  %v1380_v49 = vld [vmem:[%s4196_s2 + $0x78] sm:$0xff] }
 0x3b1   :  { %v2463_v16 = vpack.c.bf16 %v1494_v44, %v1493_v28 }
 0x3b2   :  { %v1426_v61 = vpop.permute.xlu0 %1425 }
 0x3b3   :  { %2464 = vmatprep.subr.bf16.mxu0 %v2463_v16  ;;  %v1495_v45 = vmul.f32 %v1426_v61, %v1367_v6 }
 0x3b4   :  { %2466 = vmatpush3.bf16.msra.mxu0 %v2463_v16 }
 0x3b6   :  { %v1431_v12 = vpop.permute.xlu0 %1430 }
 0x3b7   :  { %v1496_v4 = vmul.f32 %v1431_v12, %v1368_v2 }
 0x3b9   :  { %v2467_v11 = vpack.c.bf16 %v1496_v4, %v1495_v45 }
 0x3ba   :  { %v1436_v63 = vpop.permute.xlu0 %1435 }
 0x3bb   :  { %2468 = vmatprep.subr.bf16.mxu0 %v2467_v11  ;;  %v1497_v56 = vmul.f32 %v1436_v63, %v1369_v38 }
 0x3bc   :  { %2470 = vmatpush3.bf16.msra.mxu0 %v2467_v11 }
 0x3be   :  { %v1441_v14 = vpop.permute.xlu0 %1440 }
 0x3bf   :  { %v1498_v41 = vmul.f32 %v1441_v14, %v1370_v5 }
 0x3c1   :  { %v2471_v20 = vpack.c.bf16 %v1498_v41, %v1497_v56 }
 0x3c2   :  { %v1446_v62 = vpop.permute.xlu0 %1445 }
 0x3c3   :  { %2472 = vmatprep.subr.bf16.mxu0 %v2471_v20  ;;  %v1499_v36 = vmul.f32 %v1446_v62, %v1371_v58 }
 0x3c4   :  { %2474 = vmatpush3.bf16.msra.mxu0 %v2471_v20 }
 0x3c6   :  { %v1451_v0 = vpop.permute.xlu0 %1450 }
 0x3c7   :  { %v1500_v24 = vmul.f32 %v1451_v0, %v1372_v51 }
 0x3c9   :  { %v2475_v52 = vpack.c.bf16 %v1500_v24, %v1499_v36 }
 0x3ca   :  { %v1456_v29 = vpop.permute.xlu0 %1455 }
 0x3cb   :  { %2476 = vmatprep.subr.bf16.mxu0 %v2475_v52  ;;  %v1501_v48 = vmul.f32 %v1456_v29, %v1373_v40 }
 0x3cc   :  { %2478 = vmatpush3.bf16.msra.mxu0 %v2475_v52 }
 0x3ce   :  { %v1461_v25 = vpop.permute.xlu1 %1460 }
 0x3cf   :  { %v1502_v19 = vmul.f32 %v1461_v25, %v1374_v15 }
 0x3d1   :  { %v2479_v42 = vpack.c.bf16 %v1502_v19, %v1501_v48 }
 0x3d2   :  { %v1466_v8 = vpop.permute.xlu0 %1465 }
 0x3d3   :  { %2480 = vmatprep.subr.bf16.mxu0 %v2479_v42  ;;  %v1503_v53 = vmul.f32 %v1466_v8, %v1375_v33 }
 0x3d4   :  { %2482 = vmatpush3.bf16.msra.mxu0 %v2479_v42 }
 0x3d6   :  { %v1471_v59 = vpop.permute.xlu0 %1470 }
 0x3d7   :  { %v1504_v60 = vmul.f32 %v1471_v59, %v1376_v57 }
 0x3d9   :  { %v2483_v9 = vpack.c.bf16 %v1504_v60, %v1503_v53 }
 0x3da   :  { %v1476_v47 = vpop.permute.xlu0 %1475 }
 0x3db   :  { %2484 = vmatprep.subr.bf16.mxu0 %v2483_v9  ;;  %v1505_v21 = vmul.f32 %v1476_v47, %v1377_v27 }
 0x3dc   :  { %2486 = vmatpush3.bf16.msra.mxu0 %v2483_v9 }
 0x3de   :  { %v1481_v3 = vpop.permute.xlu0 %1480 }
 0x3df   :  { %v1506_v30 = vmul.f32 %v1481_v3, %v1378_v18 }
 0x3e1   :  { %v2487_v23 = vpack.c.bf16 %v1506_v30, %v1505_v21 }
 0x3e2   :  { %v1486_v26 = vpop.permute.xlu0 %1485 }
 0x3e3   :  { %2488 = vmatprep.subr.bf16.mxu0 %v2487_v23  ;;  %v1507_v28 = vmul.f32 %v1486_v26, %v1379_v32 }
 0x3e4   :  { %2490 = vmatpush3.bf16.msra.mxu0 %v2487_v23  ;;  %v2230_v23 = vld [vmem:[%s4197_s3 + $0x1] sm:$0x1] }
 0x3e6   :  { %v1491_v34 = vpop.permute.xlu0 %1490 }
 0x3e7   :  { %v1508_v44 = vmul.f32 %v1491_v34, %v1380_v49 }
 0x3e9   :  { %v2491_v16 = vpack.c.bf16 %v1508_v44, %v1507_v28 }
 0x3eb   :  { %2492 = vmatprep.subr.bf16.mxu0 %v2491_v16 }
 0x3ec   :  { %2494 = vmatpush3.bf16.msra.mxu0 %v2491_v16 }
 0x3ef   :  { %2367 = vmatmul.mubr.f32.vlgmr.msra.gmra.mrb[0].mxu0 %v3788_v13 }
 0x3f0   :  { %2369 = vmatprep.mubr.f32.mxu0 %v3819_v46 }
 0x3f3   :  { %2370 = vmatmul.mubr.f32.gmra.mrb[2].mxu0 %v3833_v39 }
 0x3f4   :  { %2372 = vmatprep.mubr.f32.mxu0 %v3844_v17 }
 0x3f7   :  { %2373 = vmatmul.mubr.f32.gmra.mrb[4].mxu0 %v3850_v54 }
 0x3f8   :  { %2375 = vmatprep.mubr.f32.mxu0 %v3855_v7 }
 0x3fb   :  { %2376 = vmatmul.mubr.f32.gmra.mrb[6].mxu0 %v3862_v37 }
 0x3fc   :  { %2378 = vmatprep.mubr.f32.mxu0 %v4404_v22 }
 0x3ff   :  { %2379 = vmatmul.mubr.f32.gmra.mrb[8].mxu0 %v4407_v10 }
 0x400   :  { %2381 = vmatprep.mubr.f32.mxu0 %v4408_v55 }
 0x403   :  { %2382 = vmatmul.mubr.f32.gmra.mrb[10].mxu0 %v4409_v31 }
 0x404   :  { %2384 = vmatprep.mubr.f32.mxu0 %v4410_v43 }
 0x407   :  { %2385 = vmatmul.mubr.f32.gmra.mrb[12].mxu0 %v3946_v50 }
 0x408   :  { %2387 = vmatprep.mubr.f32.mxu0 %v3952_v1 }
 0x40b   :  { %2388 = vmatmul.mubr.f32.gmra.mrb[14].mxu0 %v3967_v35 }
 0x4c2   :  { %v2368_v13 = vpop.f32.mrb[0].mxu0 }
 0x4c3   :  { %v1575_v46 = vpop.f32.mrb[1].mxu0 }
 0x4c6   :  { %v2371_v39 = vpop.f32.mrb[2].mxu0 }
 0x4c7   :  { %v1585_v17 = vpop.f32.mrb[3].mxu0 }
 0x4ca   :  { %v2374_v54 = vpop.f32.mrb[4].mxu0 }
 0x4cb   :  { %v1655_v7 = vmax.f32 %v2368_v13, %v2374_v54  ;;  %v1595_v37 = vpop.f32.mrb[5].mxu0 }
 0x4cc   :  { %v1654_v22 = vmax.f32 %v1575_v46, %v1595_v37 }
 0x4ce   :  { %v2377_v10 = vpop.f32.mrb[6].mxu0 }
 0x4cf   :  { %v1657_v55 = vmax.f32 %v2371_v39, %v2377_v10  ;;  %v1605_v61 = vpop.f32.mrb[7].mxu0 }
 0x4d0   :  { %v1656_v31 = vmax.f32 %v1585_v17, %v1605_v61 }
 0x4d2   :  { %v2380_v6 = vpop.f32.mrb[8].mxu0 }
 0x4d3   :  { %v1615_v43 = vpop.f32.mrb[9].mxu0 }
 0x4d6   :  { %v2383_v2 = vpop.f32.mrb[10].mxu0 }
 0x4d7   :  { %v1625_v50 = vpop.f32.mrb[11].mxu0 }
 0x4da   :  { %v2386_v12 = vpop.f32.mrb[12].mxu0 }
 0x4db   :  { %v1659_v1 = vmax.f32 %v2380_v6, %v2386_v12  ;;  %v1635_v45 = vpop.f32.mrb[13].mxu0 }
 0x4dc   :  { %v1658_v35 = vmax.f32 %v1615_v43, %v1635_v45  ;;  %v2232_v43 = vld [vmem:[%s4196_s2 + $0x88] sm:$0xff] }
 0x4dd   :  { %v4039_v4 = vmax.f32 %v1655_v7, %v1659_v1 }
 0x4de   :  { %v1662_v11 = vmax.f32 %v1654_v22, %v1658_v35  ;;  %v2389_v63 = vpop.f32.mrb[14].mxu0  ;;  %v2233_v35 = vld [vmem:[%s4196_s2 + $0x90] sm:$0xff] }
 0x4df   :  { %v1661_v38 = vmax.f32 %v2383_v2, %v2389_v63  ;;  %v1645_v5 = vpop.f32.mrb[15].mxu0  ;;  %v1678_v14 = vmul.f32 %v4039_v4, %v4039_v4 }
 0x4e0   :  { %v1677_v56 = vmul.f32 %v1662_v11, %v1662_v11  ;;  %v1660_v41 = vmax.f32 %v1625_v50, %v1645_v5  ;;  %2422 = vmatprep.mubr.f32.mxu1 %v1662_v11  ;;  %v1668_v62 = vadd.f32 %v4039_v4, %v1662_v11  ;;  %v2234_v11 = vld [vmem:[%s4196_s2 + $0x98] sm:$0xff] }
 0x4e1   :  { %v4043_v20 = vmax.f32 %v1657_v55, %v1661_v38 }
 0x4e2   :  { %v4046_v58 = vmax.f32 %v1656_v31, %v1660_v41  ;;  %v1681_v51 = vadd.f32 %v1678_v14, %v1677_v56  ;;  %v2231_v31 = vld [vmem:[%s4196_s2 + $0x80] sm:$0xff] }
 0x4e3   :  { %v1680_v24 = vmul.f32 %v4043_v20, %v4043_v20  ;;  %v2235_v41 = vld [vmem:[%s4196_s2 + $0xa0] sm:$0xff] }
 0x4e4   :  { %v1669_v0 = vadd.f32 %v1668_v62, %v4046_v58  ;;  %v1679_v36 = vmul.f32 %v4046_v58, %v4046_v58  ;;  %v2236_v62 = vld [vmem:[%s4196_s2 + $0xa8] sm:$0xff] }
 0x4e6   :  { %v1670_v52 = vadd.f32 %v1669_v0, %v4043_v20  ;;  %v1682_v40 = vadd.f32 %v1681_v51, %v1679_v36 }
 0x4e8   :  { %v1671_v29 = vrot.slane %v1670_v52, 4  ;;  %v1683_v15 = vadd.f32 %v1682_v40, %v1680_v24  ;;  %v2237_v40 = vld [vmem:[%s4196_s2 + $0xb0] sm:$0xff] }
 0x4ea   :  { %v1672_v25 = vadd.f32 %v1671_v29, %v1670_v52  ;;  %v1684_v48 = vrot.slane %v1683_v15, 4  ;;  %v2238_v29 = vld [vmem:[%s4196_s2 + $0xb8] sm:$0xff] }
 0x4ec   :  { %v1673_v19 = vrot.slane %v1672_v25, 2  ;;  %v1685_v42 = vadd.f32 %v1684_v48, %v1683_v15 }
 0x4ee   :  { %v1674_v8 = vadd.f32 %v1673_v19, %v1672_v25  ;;  %v1686_v33 = vrot.slane %v1685_v42, 2 }
 0x4f0   :  { %v1675_v57 = vrot.slane %v1674_v8, 1  ;;  %v1687_v59 = vadd.f32 %v1686_v33, %v1685_v42  ;;  %v2240_v33 = vld [vmem:[%s4196_s2 + $0xc8] sm:$0xff] }
 0x4f2   :  { %v1676_v53 = vadd.f32 %v1675_v57, %v1674_v8  ;;  %v1688_v60 = vrot.slane %v1687_v59, 1  ;;  %v2239_v8 = vld [vmem:[%s4196_s2 + $0xc0] sm:$0xff] }
 0x4f4   :  { %v1689_v9 = vadd.f32 %v1688_v60, %v1687_v59  ;;  %v1690_v47 = vmul.f32 0.03125, %v1676_v53 }
 0x4f6   :  { %v1691_v27 = vmul.f32 0.03125, %v1689_v9  ;;  %v1692_v18 = vmul.f32 %v1690_v47, %v1690_v47  ;;  %v2241_v47 = vld [vmem:[%s4196_s2 + $0xd0] sm:$0xff] }
 0x4f8   :  { %v1693_v3 = vsub.f32 %v1691_v27, %v1692_v18  ;;  %v2242_v27 = vld [vmem:[%s4196_s2 + $0xd8] sm:$0xff] }
 0x4fa   :  { %v1694_v21 = vmax.f32 %v1693_v3, 0.0 }
 0x4fc   :  { %v1695_v30 = vadd.f32 1e-05, %v1694_v21 }
 0x4fe   :  { %2609 = vrsqrt.f32 %v1695_v30 }
 0x508   :  { %v2610_v26 = vpop.eup %2609 }
 0x509   :  { %v1697_v32 = vmul.f32 %v2610_v26, %v2230_v23  ;;  %v2243_v26 = vld [vmem:[%s4196_s2 + $0xe0] sm:$0xff] }
 0x50b   :  { %1715 = vxpose.xlu0.b32.start.end [1/1] (short) %v1697_v32, 128  ;;  %v2244_v32 = vld [vmem:[%s4196_s2 + $0xe8] sm:$0xff] }
 0x58b   :  { %v1731_v49 = vpop.trf.xlu0 }
 0x58c   :  { %1749 = vperm.xlu0 %2605, %v1731_v49  }
 0x58f   :  { %v1732_v34 = vpop.trf.xlu0 }
 0x590   :  { %1754 = vperm.xlu1 %2606, %v1732_v34  }
 0x593   :  { %v1733_v28 = vpop.trf.xlu0 }
 0x594   :  { %1759 = vperm.xlu1 %2606, %v1733_v28  }
 0x597   :  { %v1734_v44 = vpop.trf.xlu0 }
 0x598   :  { %1764 = vperm.xlu1 %2606, %v1734_v44  }
 0x59b   :  { %v1735_v16 = vpop.trf.xlu0 }
 0x59c   :  { %1769 = vperm.xlu1 %2606, %v1735_v16  }
 0x59f   :  { %v1736_v13 = vpop.trf.xlu0 }
 0x5a0   :  { %1774 = vperm.xlu1 %2606, %v1736_v13   ;;  %v2245_v13 = vld [vmem:[%s4196_s2 + $0xf0] sm:$0xff] }
 0x5a3   :  { %v1737_v46 = vpop.trf.xlu0 }
 0x5a4   :  { %1779 = vperm.xlu1 %2606, %v1737_v46   ;;  %v2246_v46 = vld [vmem:[%s4196_s2 + $0xf8] sm:$0xff] }
 0x5a7   :  { %v1738_v39 = vpop.trf.xlu0 }
 0x5a8   :  { %1784 = vperm.xlu1 %2606, %v1738_v39  }
 0x5ab   :  { %v1739_v17 = vpop.trf.xlu0 }
 0x5ac   :  { %1789 = vperm.xlu1 %2606, %v1739_v17  }
 0x5af   :  { %v1740_v54 = vpop.trf.xlu0 }
 0x5b0   :  { %1794 = vperm.xlu1 %2606, %v1740_v54  }
 0x5b3   :  { %v1741_v7 = vpop.trf.xlu0 }
 0x5b4   :  { %1799 = vperm.xlu1 %2606, %v1741_v7  }
 0x5b7   :  { %v1742_v37 = vpop.trf.xlu0 }
 0x5b8   :  { %1804 = vperm.xlu1 %2606, %v1742_v37  }
 0x5bb   :  { %v1743_v22 = vpop.trf.xlu0 }
 0x5bc   :  { %1809 = vperm.xlu1 %2606, %v1743_v22  }
 0x5bf   :  { %v1744_v10 = vpop.trf.xlu0 }
 0x5c0   :  { %1814 = vperm.xlu1 %2606, %v1744_v10  }
 0x5c3   :  { %v1745_v55 = vpop.trf.xlu0 }
 0x5c4   :  { %1819 = vperm.xlu1 %2606, %v1745_v55  }
 0x5c7   :  { %v1746_v61 = vpop.trf.xlu0 }
 0x5c8   :  { %1824 = vperm.xlu1 %2606, %v1746_v61  }
 0x60b   :  { %v1750_v6 = vpop.permute.xlu0 %1749 }
 0x60c   :  { %v1827_v50 = vmul.f32 %v2231_v31, %v1750_v6 }
 0x60f   :  { %v1755_v2 = vpop.permute.xlu1 %1754 }
 0x610   :  { %v1828_v12 = vmul.f32 %v2232_v43, %v1755_v2 }
 0x612   :  { %v2495_v1 = vpack.c.bf16 %v1828_v12, %v1827_v50 }
 0x613   :  { %v1760_v45 = vpop.permute.xlu1 %1759 }
 0x614   :  { %2496 = vmatprep.subr.bf16.mxu1 %v2495_v1  ;;  %v1829_v38 = vmul.f32 %v2233_v35, %v1760_v45 }
 0x615   :  { %2498 = vmatpush3.bf16.msra.mxu1 %v2495_v1 }
 0x617   :  { %v1765_v63 = vpop.permute.xlu1 %1764 }
 0x618   :  { %v1830_v5 = vmul.f32 %v2234_v11, %v1765_v63 }
 0x61a   :  { %v2499_v14 = vpack.c.bf16 %v1830_v5, %v1829_v38 }
 0x61b   :  { %v1770_v56 = vpop.permute.xlu1 %1769 }
 0x61c   :  { %2500 = vmatprep.subr.bf16.mxu1 %v2499_v14  ;;  %v1831_v0 = vmul.f32 %v2235_v41, %v1770_v56 }
 0x61d   :  { %2502 = vmatpush3.bf16.msra.mxu1 %v2499_v14 }
 0x61f   :  { %v1775_v51 = vpop.permute.xlu1 %1774 }
 0x620   :  { %v1832_v36 = vmul.f32 %v2236_v62, %v1775_v51 }
 0x622   :  { %v2503_v24 = vpack.c.bf16 %v1832_v36, %v1831_v0  ;;  %v2247_v0 = vld [vmem:[%s4197_s3 + $0x2] sm:$0x1] }
 0x623   :  { %v1780_v52 = vpop.permute.xlu1 %1779 }
 0x624   :  { %2504 = vmatprep.subr.bf16.mxu1 %v2503_v24  ;;  %v1833_v25 = vmul.f32 %v2237_v40, %v1780_v52 }
 0x625   :  { %2506 = vmatpush3.bf16.msra.mxu1 %v2503_v24 }
 0x627   :  { %v1785_v15 = vpop.permute.xlu1 %1784 }
 0x628   :  { %v1834_v48 = vmul.f32 %v2238_v29, %v1785_v15  ;;  %v2642_v15 = vmov 0.0|0.0  }
 0x629   :  { %2527 = vmatprep.subr.bf16.mxu0 %v2642_v15 }
 0x62a   :  { %v2507_v19 = vpack.c.bf16 %v1834_v48, %v1833_v25 }
 0x62b   :  { %v1790_v42 = vpop.permute.xlu1 %1789 }
 0x62c   :  { %2508 = vmatprep.subr.bf16.mxu1 %v2507_v19  ;;  %v1835_v59 = vmul.f32 %v2239_v8, %v1790_v42 }
 0x62d   :  { %2510 = vmatpush3.bf16.msra.mxu1 %v2507_v19 }
 0x62f   :  { %v1795_v57 = vpop.permute.xlu1 %1794 }
 0x630   :  { %v1836_v53 = vmul.f32 %v2240_v33, %v1795_v57 }
 0x632   :  { %v2511_v60 = vpack.c.bf16 %v1836_v53, %v1835_v59 }
 0x633   :  { %v1800_v9 = vpop.permute.xlu1 %1799 }
 0x634   :  { %2512 = vmatprep.subr.bf16.mxu1 %v2511_v60  ;;  %v1837_v3 = vmul.f32 %v2241_v47, %v1800_v9 }
 0x635   :  { %2514 = vmatpush3.bf16.msra.mxu1 %v2511_v60 }
 0x637   :  { %v1805_v18 = vpop.permute.xlu1 %1804 }
 0x638   :  { %v1838_v21 = vmul.f32 %v2242_v27, %v1805_v18  ;;  %v2644_v18 = vmov 0.0  }
 0x639   :  { %2460 = vmatprep.mubr.msk.f32.mxu0 %vm2643_vm0, %v2644_v18 }
 0x63a   :  { %v2515_v30 = vpack.c.bf16 %v1838_v21, %v1837_v3  ;;  %v2248_v21 = vld [vmem:[%s4196_s2 + $0x100] sm:$0xff] }
 0x63b   :  { %v1810_v23 = vpop.permute.xlu1 %1809 }
 0x63c   :  { %2516 = vmatprep.subr.bf16.mxu1 %v2515_v30  ;;  %v1839_v34 = vmul.f32 %v2243_v26, %v1810_v23 }
 0x63d   :  { %2518 = vmatpush3.bf16.msra.mxu1 %v2515_v30  ;;  %v2249_v30 = vld [vmem:[%s4196_s2 + $0x108] sm:$0xff] }
 0x63f   :  { %v1815_v49 = vpop.permute.xlu1 %1814 }
 0x640   :  { %v1840_v28 = vmul.f32 %v2244_v32, %v1815_v49 }
 0x642   :  { %v2519_v44 = vpack.c.bf16 %v1840_v28, %v1839_v34  ;;  %v2250_v28 = vld [vmem:[%s4196_s2 + $0x110] sm:$0xff] }
 0x643   :  { %v1820_v16 = vpop.permute.xlu1 %1819 }
 0x644   :  { %2520 = vmatprep.subr.bf16.mxu1 %v2519_v44  ;;  %v1841_v17 = vmul.f32 %v2245_v13, %v1820_v16 }
 0x645   :  { %2522 = vmatpush3.bf16.msra.mxu1 %v2519_v44  ;;  %v2251_v44 = vld [vmem:[%s4196_s2 + $0x118] sm:$0xff] }
 0x647   :  { %v1825_v39 = vpop.permute.xlu1 %1824 }
 0x648   :  { %v1842_v54 = vmul.f32 %v2246_v46, %v1825_v39 }
 0x64a   :  { %v2523_v7 = vpack.c.bf16 %v1842_v54, %v1841_v17  ;;  %v2252_v54 = vld [vmem:[%s4196_s2 + $0x120] sm:$0xff] }
 0x64c   :  { %2524 = vmatprep.subr.bf16.mxu1 %v2523_v7 }
 0x64d   :  { %2526 = vmatpush3.bf16.msra.mxu1 %v2523_v7  ;;  %v2253_v7 = vld [vmem:[%s4196_s2 + $0x128] sm:$0xff] }
 0x650   :  { %2423 = vmatmul.mubr.f32.vlgmr.msra.gmra.mrb[0].mxu1 %v4039_v4 }
 0x651   :  { %2425 = vmatprep.mubr.f32.mxu1 %v4046_v58 }
 0x654   :  { %2426 = vmatmul.mubr.f32.gmra.mrb[2].mxu1 %v4043_v20 }
 0x723   :  { %v2424_v37 = vpop.f32.mrb[0].mxu1 }
 0x724   :  { %v1909_v22 = vpop.f32.mrb[1].mxu1 }
 0x725   :  { %v1928_v10 = vmax.f32 %v1909_v22, %v2424_v37 }
 0x727   :  { %v2427_v55 = vpop.f32.mrb[2].mxu1 }
 0x728   :  { %v1919_v61 = vpop.f32.mrb[3].mxu1 }
 0x729   :  { %v1929_v31 = vmax.f32 %v1919_v61, %v2427_v55 }
 0x72b   :  { %v4108_v6 = vmax.f32 %v1928_v10, %v1929_v31  ;;  %v2254_v31 = vld [vmem:[%s4196_s2 + $0x130] sm:$0xff] }
 0x72d   :  { %v1933_v43 = vrot.slane %v4108_v6, 4  ;;  %v1939_v2 = vmul.f32 %v4108_v6, %v4108_v6 }
 0x72f   :  { %v1934_v50 = vadd.f32 %v1933_v43, %v4108_v6  ;;  %v1940_v4 = vrot.slane %v1939_v2, 4  ;;  %v2255_v43 = vld [vmem:[%s4196_s2 + $0x138] sm:$0xff] }
 0x731   :  { %v1935_v12 = vrot.slane %v1934_v50, 2  ;;  %v1941_v58 = vadd.f32 %v1940_v4, %v1939_v2 }
 0x733   :  { %v1936_v1 = vadd.f32 %v1935_v12, %v1934_v50  ;;  %v1942_v20 = vrot.slane %v1941_v58, 2 }
 0x735   :  { %v1937_v45 = vrot.slane %v1936_v1, 1  ;;  %v1943_v35 = vadd.f32 %v1942_v20, %v1941_v58  ;;  %v2256_v58 = vld [vmem:[%s4196_s2 + $0x140] sm:$0xff]  ;;  %v2257_v20 = vld [vmem:[%s4196_s2 + $0x148] sm:$0xff] }
 0x737   :  { %v1938_v11 = vadd.f32 %v1937_v45, %v1936_v1  ;;  %v1944_v63 = vrot.slane %v1943_v35, 1 }
 0x739   :  { %v1945_v38 = vadd.f32 %v1944_v63, %v1943_v35  ;;  %v1946_v5 = vmul.f32 0.125, %v1938_v11 }
 0x73b   :  { %v1947_v14 = vmul.f32 0.125, %v1945_v38  ;;  %v1948_v56 = vmul.f32 %v1946_v5, %v1946_v5  ;;  %v2258_v5 = vld [vmem:[%s4196_s2 + $0x150] sm:$0xff] }
 0x73d   :  { %v1949_v41 = vsub.f32 %v1947_v14, %v1948_v56  ;;  %v2259_v14 = vld [vmem:[%s4196_s2 + $0x158] sm:$0xff] }
 0x73f   :  { %v1950_v62 = vmax.f32 %v1949_v41, 0.0 }
 0x741   :  { %v1951_v51 = vadd.f32 1e-05, %v1950_v62 }
 0x743   :  { %2611 = vrsqrt.f32 %v1951_v51 }
 0x74d   :  { %v2612_v36 = vpop.eup %2611 }
 0x74e   :  { %v1953_v24 = vmul.f32 %v2612_v36, %v2247_v0  ;;  %v2260_v36 = vld [vmem:[%s4196_s2 + $0x160] sm:$0xff] }
 0x750   :  { %1971 = vxpose.xlu1.b32.start.end [1/1] (short) %v1953_v24, 128  ;;  %v2261_v24 = vld [vmem:[%s4196_s2 + $0x168] sm:$0xff] }
 0x7d0   :  { %v1987_v52 = vpop.trf.xlu1 }
 0x7d1   :  { %2005 = vperm.xlu0 %2605, %v1987_v52  }
 0x7d4   :  { %v1988_v40 = vpop.trf.xlu1 }
 0x7d5   :  { %2010 = vperm.xlu0 %2605, %v1988_v40  }
 0x7d8   :  { %v1989_v29 = vpop.trf.xlu1 }
 0x7d9   :  { %2015 = vperm.xlu0 %2605, %v1989_v29  }
 0x7dc   :  { %v1990_v25 = vpop.trf.xlu1 }
 0x7dd   :  { %2020 = vperm.xlu0 %2605, %v1990_v25  }
 0x7e0   :  { %v1991_v48 = vpop.trf.xlu1 }
 0x7e1   :  { %2025 = vperm.xlu0 %2605, %v1991_v48  }
 0x7e4   :  { %v1992_v19 = vpop.trf.xlu1 }
 0x7e5   :  { %2030 = vperm.xlu0 %2605, %v1992_v19   ;;  %v2262_v19 = vld [vmem:[%s4196_s2 + $0x170] sm:$0xff] }
 0x7e8   :  { %v1993_v42 = vpop.trf.xlu1 }
 0x7e9   :  { %2035 = vperm.xlu0 %2605, %v1993_v42   ;;  %v2263_v42 = vld [vmem:[%s4196_s2 + $0x178] sm:$0xff] }
 0x7ec   :  { %v1994_v8 = vpop.trf.xlu1 }
 0x7ed   :  { %2040 = vperm.xlu0 %2605, %v1994_v8  }
 0x7f0   :  { %v1995_v33 = vpop.trf.xlu1 }
 0x7f1   :  { %2045 = vperm.xlu0 %2605, %v1995_v33  }
 0x7f4   :  { %v1996_v57 = vpop.trf.xlu1 }
 0x7f5   :  { %2050 = vperm.xlu1 %2606, %v1996_v57  }
 0x7f8   :  { %v1997_v59 = vpop.trf.xlu1 }
 0x7f9   :  { %2055 = vperm.xlu0 %2605, %v1997_v59  }
 0x7fc   :  { %v1998_v53 = vpop.trf.xlu1 }
 0x7fd   :  { %2060 = vperm.xlu0 %2605, %v1998_v53  }
 0x800   :  { %v1999_v60 = vpop.trf.xlu1 }
 0x801   :  { %2065 = vperm.xlu0 %2605, %v1999_v60  }
 0x804   :  { %v2000_v9 = vpop.trf.xlu1 }
 0x805   :  { %2070 = vperm.xlu0 %2605, %v2000_v9  }
 0x808   :  { %v2001_v47 = vpop.trf.xlu1 }
 0x809   :  { %2075 = vperm.xlu0 %2605, %v2001_v47  }
 0x80c   :  { %v2002_v27 = vpop.trf.xlu1 }
 0x80d   :  { %2080 = vperm.xlu0 %2605, %v2002_v27  }
 0x850   :  { %v2006_v3 = vpop.permute.xlu0 %2005 }
 0x851   :  { %v2083_v26 = vmul.f32 %v2248_v21, %v2006_v3 }
 0x854   :  { %v2011_v23 = vpop.permute.xlu0 %2010 }
 0x855   :  { %v2084_v32 = vmul.f32 %v2249_v30, %v2011_v23 }
 0x857   :  { %v2528_v49 = vpack.c.bf16 %v2084_v32, %v2083_v26 }
 0x858   :  { %v2016_v34 = vpop.permute.xlu0 %2015 }
 0x859   :  { %2529 = vmatpush3.bf16.msra.mxu0 %v2528_v49  ;;  %v2085_v13 = vmul.f32 %v2250_v28, %v2016_v34 }
 0x85a   :  { %2530 = vmatprep.subr.bf16.mxu0 %v2642_v15 }
 0x85c   :  { %v2021_v16 = vpop.permute.xlu0 %2020 }
 0x85d   :  { %v2086_v46 = vmul.f32 %v2251_v44, %v2021_v16 }
 0x85f   :  { %v2531_v39 = vpack.c.bf16 %v2086_v46, %v2085_v13 }
 0x860   :  { %v2026_v17 = vpop.permute.xlu0 %2025 }
 0x861   :  { %2532 = vmatpush3.bf16.msra.mxu0 %v2531_v39  ;;  %v2087_v22 = vmul.f32 %v2252_v54, %v2026_v17 }
 0x862   :  { %2533 = vmatprep.subr.bf16.mxu0 %v2642_v15 }
 0x864   :  { %v2031_v37 = vpop.permute.xlu0 %2030 }
 0x865   :  { %v2088_v10 = vmul.f32 %v2253_v7, %v2031_v37  ;;  %v2264_v37 = vld [vmem:[%s4197_s3 + $0x3] sm:$0x1] }
 0x867   :  { %v2534_v55 = vpack.c.bf16 %v2088_v10, %v2087_v22 }
 0x868   :  { %v2036_v61 = vpop.permute.xlu0 %2035 }
 0x869   :  { %2535 = vmatpush3.bf16.msra.mxu0 %v2534_v55  ;;  %v2089_v50 = vmul.f32 %v2254_v31, %v2036_v61  ;;  %v2205_v55 = vld [vmem:[%s4198_s4] sm:$0x1]  ;;  %v4412_v61 = vld [vmem:[#allocation73_spill] sm:$0xff] }
 0x86a   :  { %2536 = vmatprep.subr.bf16.mxu0 %v2642_v15 }
 0x86c   :  { %v2041_v2 = vpop.permute.xlu0 %2040 }
 0x86d   :  { %v2090_v4 = vmul.f32 %v2255_v43, %v2041_v2 }
 0x86f   :  { %v2537_v12 = vpack.c.bf16 %v2090_v4, %v2089_v50 }
 0x870   :  { %v2046_v1 = vpop.permute.xlu0 %2045 }
 0x871   :  { %2538 = vmatpush3.bf16.msra.mxu0 %v2537_v12  ;;  %v2091_v35 = vmul.f32 %v2256_v58, %v2046_v1 }
 0x872   :  { %2539 = vmatprep.subr.bf16.mxu0 %v2642_v15 }
 0x874   :  { %v2051_v45 = vpop.permute.xlu1 %2050 }
 0x875   :  { %v2092_v11 = vmul.f32 %v2257_v20, %v2051_v45 }
 0x877   :  { %v2540_v63 = vpack.c.bf16 %v2092_v11, %v2091_v35 }
 0x878   :  { %v2056_v38 = vpop.permute.xlu0 %2055 }
 0x879   :  { %2541 = vmatpush3.bf16.msra.mxu0 %v2540_v63  ;;  %v2093_v41 = vmul.f32 %v2258_v5, %v2056_v38 }
 0x87a   :  { %2542 = vmatprep.subr.bf16.mxu0 %v2642_v15 }
 0x87c   :  { %v2061_v56 = vpop.permute.xlu0 %2060 }
 0x87d   :  { %v2094_v62 = vmul.f32 %v2259_v14, %v2061_v56 }
 0x87f   :  { %v2543_v51 = vpack.c.bf16 %v2094_v62, %v2093_v41 }
 0x880   :  { %v2066_v0 = vpop.permute.xlu0 %2065 }
 0x881   :  { %2544 = vmatpush3.bf16.msra.mxu0 %v2543_v51  ;;  %v2095_v40 = vmul.f32 %v2260_v36, %v2066_v0 }
 0x882   :  { %2545 = vmatprep.subr.bf16.mxu0 %v2642_v15 }
 0x884   :  { %v2071_v52 = vpop.permute.xlu0 %2070 }
 0x885   :  { %v2096_v29 = vmul.f32 %v2261_v24, %v2071_v52 }
 0x887   :  { %v2546_v25 = vpack.c.bf16 %v2096_v29, %v2095_v40 }
 0x888   :  { %v2076_v48 = vpop.permute.xlu0 %2075 }
 0x889   :  { %2547 = vmatpush3.bf16.msra.mxu0 %v2546_v25  ;;  %v2097_v33 = vmul.f32 %v2262_v19, %v2076_v48 }
 0x88a   :  { %2548 = vmatprep.subr.bf16.mxu0 %v2642_v15 }
 0x88c   :  { %v2081_v8 = vpop.permute.xlu0 %2080 }
 0x88d   :  { %v2098_v57 = vmul.f32 %v2263_v42, %v2081_v8 }
 0x88f   :  { %v2549_v59 = vpack.c.bf16 %v2098_v57, %v2097_v33 }
 0x891   :  { %2550 = vmatpush3.bf16.msra.mxu0 %v2549_v59 }
 0x894   :  { %2461 = vmatmul.mubr.f32.vlgmr.msra.gmra.mrb[16].mxu0 %v4108_v6 }
 0x967   :  { %v2165_v53 = vpop.f32.mrb[16].mxu0 }
 0x968   :  { %v2169_v60 = vrot.slane %v2165_v53, 4  ;;  %v2462_v9 = vpop.f32.mrb[17].mxu0 }
 0x96a   :  { %v2170_v47 = vmax.f32 %v2165_v53, %v2169_v60 }
 0x96c   :  { %v2171_v27 = vrot.slane %v2170_v47, 2 }
 0x96e   :  { %v2172_v18 = vmax.f32 %v2170_v47, %v2171_v27 }
 0x970   :  { %v2174_v3 = vsel %vm2173_vm1, %v2172_v18, 0.0 }
 0x971   :  { %v2175_v21 = vrot.slane %v2174_v3, 4 }
 0x973   :  { %v2176_v30 = vadd.f32 %v2175_v21, %v2174_v3 }
 0x975   :  { %v2177_v23 = vrot.slane %v2176_v30, 2 }
 0x977   :  { %v2178_v26 = vadd.f32 %v2177_v23, %v2176_v30 }
 0x979   :  { %v2179_v15 = vrot.slane %v2178_v26, 1 }
 0x97b   :  { %v2180_v32 = vadd.f32 %v2179_v15, %v2178_v26 }
 0x97d   :  { %v2182_v49 = vmul.f32 0.5, %v2180_v32 }
 0x97f   :  { %v2183_v34 = vsub.f32 %v2172_v18, %v2182_v49 }
 0x981   :  { %v2184_v28 = vmul.f32 %v2183_v34, %v2183_v34 }
 0x983   :  { %v2185_v44 = vsel %vm2173_vm1, %v2184_v28, 0.0 }
 0x984   :  { %v2186_v16 = vrot.slane %v2185_v44, 4 }
 0x986   :  { %v2187_v6 = vadd.f32 %v2186_v16, %v2185_v44 }
 0x988   :  { %v2188_v13 = vrot.slane %v2187_v6, 2 }
 0x98a   :  { %v2189_v46 = vadd.f32 %v2188_v13, %v2187_v6 }
 0x98c   :  { %v2190_v39 = vrot.slane %v2189_v46, 1 }
 0x98e   :  { %v2191_v17 = vadd.f32 %v2190_v39, %v2189_v46 }
 0x990   :  { %v2192_v54 = vmul.f32 0.5, %v2191_v17 }
 0x992   :  { %v2195_v7 = vadd.f32 1e-05, %v2192_v54 }
 0x994   :  { %2613 = vrsqrt.f32 %v2195_v7 }
 0x99e   :  { %v2614_v22 = vpop.eup %2613 }
 0x99f   :  { %v2197_v10 = vmul.f32 %v2614_v22, %v2264_v37 }
 0x9a1   :  { %v2202_v31 = vrot.slane %v2197_v10, %v4412_v61  ;;  %v2206_v43 = vmul.f32 %v2197_v10, %v2182_v49 }
 0x9a3   :  { %v2207_v2 = vsub.f32 %v2205_v55, %v2206_v43  ;;  %v2204_v50 = vmul.f32 %v2202_v31, %v2172_v18 }
 0x9a5   :  { %v2212_v4 = vrot.slane %v2207_v2, %v4412_v61 }
 0x9a7   :  { %v2214_v12 = vadd.f32 %v2212_v4, %v2204_v50 }
 0x9a9   :  { %2215 = vst [vmem:[#allocation2] sm:$0x3] %v2214_v12 }
 0x9aa   :  { %2626 = shalt.err (!%p2623_p4)
}
 0x9ab   :  { %s2627_s0 = scalar_lea.hbm %s4199_s5, 32 }
 0x9ac   :  { %p2628_p5 = scmp.ne.s32.totalorder %s4199_s5, %s2627_s0  ;;  %p2631_p6 = scmp.lt.u32.totalorder %s2627_s0, %s4199_s5 }
 0x9ae   :  { %p2633_p7 = pnand %p2631_p6, %p2628_p5 }
 0x9b0   :  { %2636 = shalt.err (!%p2633_p7)
}
 0x9b1   :  { %2225 = dma.vmem_to_hbm [thread:$0]  %s2223_s20, 32, %s4199_s5, [#allocation3]  }
 0x9b2   :  { %2637 = dma.done.wait [#allocation3], 32  }
 0x9b3   :  { %2638 = vsyncadd [#allocation3], 4294967264 }
 0x9b4   :  { %2229 = vsyncpa [#allocation3], 1 }

</bundles_post_ra>
